<compile_context>
chip_gen: v7x
topology: tpu7x:2x2x1
jax: 0.10.0
libtpu: 0.0.40
codegen_flags: <defaults>
</compile_context>

<pallas_src>
import functools

import jax
import jax.numpy as jnp
import numpy as np
from jax.experimental import pallas as pl
from jax.experimental.pallas import tpu as pltpu

NEG_SLOPE = 0.01              # torch leaky_relu default
BN_EPS = 1e-5                 # torch BatchNorm2d default
MATMUL_DTYPE = jnp.bfloat16   # MXU operand dtype (accumulation is f32)
TARGET_LANES = 256            # lanes per grid step (v6e/v7x MXU is 2x256 wide)


def _leaky(x):
    return jnp.where(x > 0, x, NEG_SLOPE * x)


def fused_res_blocks_kernel(x_ref, mask_ref, w1_ref, b1_ref, w2_ref, b2_ref,
                            w3_ref, b3_ref, scale_ref, o_ref, patch_ref,
                            *, shifts):
    """All Res_blocks for one batch-group, in transposed (C, M) layout.

    x_ref    : (1, C, M) f32        activations, M = images_per_group*H*W (lanes)
    mask_ref : (9, 1, M) f32        0/1 image-border masks per 3x3 tap
    w1_ref   : (B, C4, C)     bf16  conv1 weight
    b1_ref   : (B, C4, 1)     f32
    w2_ref   : (B, C16, 9*C4) bf16  conv2 weight in im2col (tap-major) order
    b2_ref   : (B, C16, 1)    f32
    w3_ref   : (B, C16, C, 1) f32   conv3 weight columns with BN scale folded
    b3_ref   : (B, C, 1)      f32   conv3 bias with BN scale/shift folded in
    scale_ref: (B, C, 1)      f32   BN scale for the residual path
    o_ref    : (1, C, M) f32
    patch_ref: (9*C4, M) f32        VMEM scratch holding the im2col patch
    shifts   : static tuple of 9 lane-roll amounts (one per 3x3 tap)
    """
    num_blocks = w1_ref.shape[0]
    c4 = w1_ref.shape[1]
    c16 = w3_ref.shape[1]

    x = x_ref[0]                                          # (C, M) f32
    for blk in range(num_blocks):                         # unrolled Res_blocks
        # conv1 (1x1): (C4, C) @ (C, M) on the MXU, bf16 operands / f32 acc.
        h1 = jnp.dot(w1_ref[blk], x.astype(MATMUL_DTYPE),
                     preferred_element_type=jnp.float32)
        h1 = _leaky(h1 + b1_ref[blk])                     # (C4, M) f32

        # conv2 (3x3, pad=1) via roll+mask im2col: each tap is a lane rotation
        # of h1 (XLU) zeroed at image borders by a 0/1 mask (VPU), written to
        # the (9*C4, M) patch scratch; then ONE K = 9*C4 MXU matmul.
        for t, s in enumerate(shifts):
            if t == 4:                                    # centre tap: identity
                tap = h1
            else:
                rolled = pltpu.roll(h1, shift=s, axis=1) if s else h1
                tap = rolled * mask_ref[t]
            patch_ref[t * c4:(t + 1) * c4, :] = tap
        h2 = jnp.dot(w2_ref[blk], patch_ref[...].astype(MATMUL_DTYPE),
                     preferred_element_type=jnp.float32)
        h2 = _leaky(h2 + b2_ref[blk])                     # (C16, M) f32

        # conv3 (1x1, K=C16) + BN fold + residual as C16 broadcast FMAs on the
        # VPU, all f32 (no K=2 MXU matmul; residual path stays full precision).
        y = scale_ref[blk] * x + b3_ref[blk]              # (C, M) f32
        for i in range(c16):
            y = y + w3_ref[blk, i] * h2[i:i + 1, :]       # (C,1)*(1,M) -> (C,M)
        x = _leaky(y)

    o_ref[0] = x


def _build_tap_masks(images_per_group, H, W):
    """(9, 1, M) 0/1 masks: 1 where the (dy, dx)-shifted neighbour of each
    output pixel lies inside its image (tap t = (dy+1)*3 + (dx+1))."""
    M = images_per_group * H * W
    mask = np.zeros((9, 1, M), np.float32)
    for t in range(9):
        dy, dx = t // 3 - 1, t % 3 - 1
        for b in range(images_per_group):
            for y in range(H):
                for x in range(W):
                    if 0 <= y + dy < H and 0 <= x + dx < W:
                        mask[t, 0, (b * H + y) * W + x] = 1.0
    return jnp.asarray(mask)


def _tap_shifts(M, W):
    """Static lane-roll amounts so roll(h1, shift)[:, m] == h1[:, m + dy*W+dx]
    (circular wrap positions are always masked out)."""
    return tuple((M - ((t // 3 - 1) * W + (t % 3 - 1))) % M for t in range(9))


def init_res_block_params(key, C):
    """Deterministic synthetic parameters in the PyTorch layouts of Res_block."""
    C4, C16 = C // 4, C // 16
    ks = jax.random.split(key, 8)
    return {
        "w1": jax.random.normal(ks[0], (C4, C, 1, 1), jnp.float32) / np.sqrt(C),
        "b1": 0.1 * jax.random.normal(ks[1], (C4,), jnp.float32),
        "w2": jax.random.normal(ks[2], (C16, C4, 3, 3), jnp.float32) / np.sqrt(9 * C4),
        "b2": 0.1 * jax.random.normal(ks[3], (C16,), jnp.float32),
        "w3": jax.random.normal(ks[4], (C, C16, 1, 1), jnp.float32) / np.sqrt(C16),
        "b3": 0.1 * jax.random.normal(ks[5], (C,), jnp.float32),
        "gamma": 1.0 + 0.1 * jax.random.normal(ks[6], (C,), jnp.float32),
        "beta": 0.1 * jax.random.normal(ks[7], (C,), jnp.float32),
        "mean": jnp.zeros((C,), jnp.float32),     # running stats (eval mode)
        "var": jnp.ones((C,), jnp.float32),
    }


def _pack_params(blocks):
    """Stack per-block torch-layout params into the fused-kernel layouts."""
    C4, C = blocks[0]["w1"].shape[:2]
    C16 = blocks[0]["w2"].shape[0]
    w1t, b1, w2p, b2, w3p, b3p, scl = [], [], [], [], [], [], []
    for p in blocks:
        scale = p["gamma"] * jax.lax.rsqrt(p["var"] + BN_EPS)       # (C,)
        shift = p["beta"] - p["mean"] * scale
        w1t.append(p["w1"].reshape(C4, C))
        b1.append(p["b1"].reshape(C4, 1))
        # (C16, C4, ky, kx) -> (C16, ky, kx, C4) -> (C16, 9*C4): tap-major cols.
        w2p.append(jnp.transpose(p["w2"], (0, 2, 3, 1)).reshape(C16, 9 * C4))
        b2.append(p["b2"].reshape(C16, 1))
        # Fold BN (eval): y = leaky(scale*x + (scale*w3) h2 + (scale*b3 + shift)).
        w3s = scale[:, None] * p["w3"].reshape(C, C16)              # (C, C16)
        w3p.append(jnp.transpose(w3s)[:, :, None])                  # (C16, C, 1)
        b3p.append((scale * p["b3"] + shift).reshape(C, 1))
        scl.append(scale.reshape(C, 1))
    stack = lambda xs, dt: jnp.stack(xs).astype(dt)
    return (stack(w1t, MATMUL_DTYPE), stack(b1, jnp.float32),
            stack(w2p, MATMUL_DTYPE), stack(b2, jnp.float32),
            stack(w3p, jnp.float32), stack(b3p, jnp.float32),
            stack(scl, jnp.float32))


def build_res_block_forward(x_nchw, blocks):
    """Fused forward of build_res_block.  x_nchw: (N, C, H, W) float32."""
    N, C, H, W = x_nchw.shape
    assert C % 16 == 0, "in_channels must be divisible by 16 (conv2 out = C//16)"
    hw = H * W
    C4 = C // 4

    # Group whole batch images per grid step: smallest divisor of N reaching
    # TARGET_LANES lanes, so each step feeds the (2x256) MXU densely while
    # larger batches still give multiple 'parallel' steps (v7x dual TCs).
    nb = N
    for d in range(1, N + 1):
        if N % d == 0 and d * hw >= TARGET_LANES:
            nb = d
            break
    G = N // nb
    M = nb * hw

    mask = _build_tap_masks(nb, H, W)                     # (9, 1, M) f32
    shifts = _tap_shifts(M, W)
    packed = _pack_params(blocks)

    # NCHW -> (G, C, M): channels on sublanes, batch*spatial on lanes.
    x_cm = (x_nchw.reshape(G, nb, C, hw)
            .transpose(0, 2, 1, 3)
            .reshape(G, C, M))
    # TODO(synk): if this sits inside a larger model, keep the (G, C, M) layout
    # between calls instead of transposing NCHW<->CM around every pallas_call.

    def full_spec(arr):
        nd = arr.ndim
        return pl.BlockSpec(arr.shape, lambda g, _nd=nd: (0,) * _nd)

    kernel = functools.partial(fused_res_blocks_kernel, shifts=shifts)

    y_cm = pl.pallas_call(
        kernel,
        out_shape=jax.ShapeDtypeStruct((G, C, M), jnp.float32),
        grid=(G,),
        in_specs=[
            pl.BlockSpec((1, C, M), lambda g: (g, 0, 0)),  # x (per batch group)
            full_spec(mask),                               # 3x3 tap border masks
            full_spec(packed[0]), full_spec(packed[1]),    # conv1 w / b
            full_spec(packed[2]), full_spec(packed[3]),    # conv2 w / b (im2col)
            full_spec(packed[4]), full_spec(packed[5]),    # conv3 w / b (BN folded)
            full_spec(packed[6]),                          # BN scale (residual)
        ],
        out_specs=pl.BlockSpec((1, C, M), lambda g: (g, 0, 0)),
        scratch_shapes=[pltpu.VMEM((9 * C4, M), jnp.float32)],   # im2col patch
        compiler_params=pltpu.CompilerParams(
            dimension_semantics=("parallel",)),
    )(x_cm, mask, *packed)

    return (y_cm.reshape(G, C, nb, hw)
            .transpose(0, 2, 1, 3)
            .reshape(N, C, H, W))


def res_block_ref(x_nhwc, p):
    """Pure-JAX f32 reference for one Res_block (torch semantics, eval BN)."""
    def conv(x, w_oihw, padding):
        return jax.lax.conv_general_dilated(
            x, jnp.transpose(w_oihw, (2, 3, 1, 0)), (1, 1), padding,
            dimension_numbers=("NHWC", "HWIO", "NHWC"),
            precision=jax.lax.Precision.HIGHEST)
    h = _leaky(conv(x_nhwc, p["w1"], "VALID") + p["b1"])
    h = _leaky(conv(h, p["w2"], "SAME") + p["b2"])
    h = conv(h, p["w3"], "VALID") + p["b3"]
    y = x_nhwc + h
    scale = p["gamma"] * jax.lax.rsqrt(p["var"] + BN_EPS)
    shift = p["beta"] - p["mean"] * scale
    return _leaky(y * scale + shift)


if __name__ == "__main__":
    key = jax.random.PRNGKey(0)
    kx, kp = jax.random.split(key)

    # Small shapes; in_channels must be divisible by 16 (conv2 out = C // 16).
    N, C, H, W = 2, 32, 8, 8
    x_nchw = jax.random.normal(kx, (N, C, H, W), jnp.float32)   # PyTorch layout

    blocks = [init_res_block_params(k, C) for k in jax.random.split(kp, 4)]

    y = jax.block_until_ready(jax.jit(build_res_block_forward)(x_nchw, blocks))

    # Pure-JAX f32 reference: 4 sequential Res_blocks in NHWC.
    y_ref = jnp.transpose(x_nchw, (0, 2, 3, 1))
    for p in blocks:
        y_ref = res_block_ref(y_ref, p)
    y_ref = jax.block_until_ready(jnp.transpose(y_ref, (0, 3, 1, 2)))

    # Tolerance covers bf16 MXU operands in conv1/conv2 chained through 4
    # residual blocks (conv3/BN/residual are f32); structural errors (wrong
    # tap shift/mask, fold or transpose) would be O(1).
    np.testing.assert_allclose(np.asarray(y), np.asarray(y_ref),
                               rtol=4e-2, atol=4e-2)
    print("KERNEL_OK")
</pallas_src>

<mosaic_0001>
module attributes {stable_mosaic.version = 11 : i64} {
  func.func @fused_res_blocks_kernel(%arg0: i32, %arg1: memref<1x32x128xf32, #tpu.memory_space<vmem>>, %arg2: memref<9x1x128xf32, #tpu.memory_space<vmem>>, %arg3: memref<4x8x32xbf16, #tpu.memory_space<vmem>>, %arg4: memref<4x8x1xf32, #tpu.memory_space<vmem>>, %arg5: memref<4x2x72xbf16, #tpu.memory_space<vmem>>, %arg6: memref<4x2x1xf32, #tpu.memory_space<vmem>>, %arg7: memref<4x2x32x1xf32, #tpu.memory_space<vmem>>, %arg8: memref<4x32x1xf32, #tpu.memory_space<vmem>>, %arg9: memref<4x32x1xf32, #tpu.memory_space<vmem>>, %arg10: memref<1x32x128xf32, #tpu.memory_space<vmem>>, %arg11: memref<72x128xf32, #tpu.memory_space<vmem>>) attributes {dimension_semantics = [#tpu.dimension_semantics<parallel>], iteration_bounds = array<i64: 1>, scalar_prefetch = 0 : i64, scratch_operands = 1 : i64, tpu.core_type = #tpu.core_type<tc>, window_params = [{transform_indices = @transform_0, window_bounds = array<i64: 1, 32, 128>}, {pipeline_mode = #tpu.pipeline_mode<synchronous>, transform_indices = @transform_1, window_bounds = array<i64: 9, 1, 128>}, {pipeline_mode = #tpu.pipeline_mode<synchronous>, transform_indices = @transform_2, window_bounds = array<i64: 4, 8, 32>}, {pipeline_mode = #tpu.pipeline_mode<synchronous>, transform_indices = @transform_3, window_bounds = array<i64: 4, 8, 1>}, {pipeline_mode = #tpu.pipeline_mode<synchronous>, transform_indices = @transform_4, window_bounds = array<i64: 4, 2, 72>}, {pipeline_mode = #tpu.pipeline_mode<synchronous>, transform_indices = @transform_5, window_bounds = array<i64: 4, 2, 1>}, {pipeline_mode = #tpu.pipeline_mode<synchronous>, transform_indices = @transform_6, window_bounds = array<i64: 4, 2, 32, 1>}, {pipeline_mode = #tpu.pipeline_mode<synchronous>, transform_indices = @transform_7, window_bounds = array<i64: 4, 32, 1>}, {pipeline_mode = #tpu.pipeline_mode<synchronous>, transform_indices = @transform_8, window_bounds = array<i64: 4, 32, 1>}, {transform_indices = @transform_9, window_bounds = array<i64: 1, 32, 128>}]} {
    %c0 = arith.constant 0 : index
    %c0_0 = arith.constant 0 : index
    %c0_1 = arith.constant 0 : index
    %0 = vector.load %arg1[%c0, %c0_0, %c0_1] : memref<1x32x128xf32, #tpu.memory_space<vmem>>, vector<1x32x128xf32>
    %1 = vector.shape_cast %0 : vector<1x32x128xf32> to vector<32x128xf32>
    %c0_2 = arith.constant 0 : index
    %c0_3 = arith.constant 0 : index
    %c0_4 = arith.constant 0 : index
    %2 = vector.load %arg3[%c0_2, %c0_3, %c0_4] : memref<4x8x32xbf16, #tpu.memory_space<vmem>>, vector<1x8x32xbf16>
    %3 = vector.shape_cast %2 : vector<1x8x32xbf16> to vector<8x32xbf16>
    %4 = arith.truncf %1 : vector<32x128xf32> to vector<32x128xbf16>
    %cst = arith.constant dense<0.000000e+00> : vector<8x128xf32>
    %5 = tpu.matmul %3, %4, %cst {dimension_numbers = #tpu.dot_dimension_numbers<[1], [0], [0], [1], [0, 0, 1, 1], [], []>} : vector<8x32xbf16>, vector<32x128xbf16>, vector<8x128xf32> -> vector<8x128xf32>
    %c0_5 = arith.constant 0 : index
    %c0_6 = arith.constant 0 : index
    %c0_7 = arith.constant 0 : index
    %6 = vector.load %arg4[%c0_5, %c0_6, %c0_7] : memref<4x8x1xf32, #tpu.memory_space<vmem>>, vector<1x8x1xf32>
    %7 = vector.shape_cast %6 : vector<1x8x1xf32> to vector<8x1xf32>
    %8 = vector.broadcast %7 : vector<8x1xf32> to vector<8x128xf32>
    %9 = arith.addf %5, %8 : vector<8x128xf32>
    %cst_8 = arith.constant 0.000000e+00 : f32
    %10 = vector.broadcast %cst_8 : f32 to vector<8x128xf32>
    %11 = arith.cmpf ogt, %9, %10 : vector<8x128xf32>
    %cst_9 = arith.constant 0.00999999977 : f32
    %12 = vector.broadcast %cst_9 : f32 to vector<8x128xf32>
    %13 = arith.mulf %12, %9 : vector<8x128xf32>
    %14 = arith.select %11, %9, %13 : vector<8x128xi1>, vector<8x128xf32>
    %c9_i32 = arith.constant 9 : i32
    %15 = tpu.dynamic_rotate %14 by %c9_i32 dim 1 : vector<8x128xf32>, i32 -> vector<8x128xf32>
    %c0_10 = arith.constant 0 : index
    %c0_11 = arith.constant 0 : index
    %c0_12 = arith.constant 0 : index
    %16 = vector.load %arg2[%c0_10, %c0_11, %c0_12] : memref<9x1x128xf32, #tpu.memory_space<vmem>>, vector<1x1x128xf32>
    %17 = vector.shape_cast %16 : vector<1x1x128xf32> to vector<1x128xf32>
    %18 = vector.broadcast %17 : vector<1x128xf32> to vector<8x128xf32>
    %19 = arith.mulf %15, %18 : vector<8x128xf32>
    %c0_13 = arith.constant 0 : index
    %c0_14 = arith.constant 0 : index
    %20 = vector.load %arg11[%c0_13, %c0_14] : memref<72x128xf32, #tpu.memory_space<vmem>>, vector<8x128xf32>
    tpu.vector_store %arg11[%c0_13, %c0_14], %19 {strides = array<i32>} : memref<72x128xf32, #tpu.memory_space<vmem>>, vector<8x128xf32>,
    %c8_i32 = arith.constant 8 : i32
    %21 = tpu.dynamic_rotate %14 by %c8_i32 dim 1 : vector<8x128xf32>, i32 -> vector<8x128xf32>
    %c1 = arith.constant 1 : index
    %c0_15 = arith.constant 0 : index
    %c0_16 = arith.constant 0 : index
    %22 = vector.load %arg2[%c1, %c0_15, %c0_16] : memref<9x1x128xf32, #tpu.memory_space<vmem>>, vector<1x1x128xf32>
    %23 = vector.shape_cast %22 : vector<1x1x128xf32> to vector<1x128xf32>
    %24 = vector.broadcast %23 : vector<1x128xf32> to vector<8x128xf32>
    %25 = arith.mulf %21, %24 : vector<8x128xf32>
    %c8 = arith.constant 8 : index
    %c0_17 = arith.constant 0 : index
    %26 = vector.load %arg11[%c8, %c0_17] : memref<72x128xf32, #tpu.memory_space<vmem>>, vector<8x128xf32>
    tpu.vector_store %arg11[%c8, %c0_17], %25 {strides = array<i32>} : memref<72x128xf32, #tpu.memory_space<vmem>>, vector<8x128xf32>,
    %c7_i32 = arith.constant 7 : i32
    %27 = tpu.dynamic_rotate %14 by %c7_i32 dim 1 : vector<8x128xf32>, i32 -> vector<8x128xf32>
    %c2 = arith.constant 2 : index
    %c0_18 = arith.constant 0 : index
    %c0_19 = arith.constant 0 : index
    %28 = vector.load %arg2[%c2, %c0_18, %c0_19] : memref<9x1x128xf32, #tpu.memory_space<vmem>>, vector<1x1x128xf32>
    %29 = vector.shape_cast %28 : vector<1x1x128xf32> to vector<1x128xf32>
    %30 = vector.broadcast %29 : vector<1x128xf32> to vector<8x128xf32>
    %31 = arith.mulf %27, %30 : vector<8x128xf32>
    %c16 = arith.constant 16 : index
    %c0_20 = arith.constant 0 : index
    %32 = vector.load %arg11[%c16, %c0_20] : memref<72x128xf32, #tpu.memory_space<vmem>>, vector<8x128xf32>
    tpu.vector_store %arg11[%c16, %c0_20], %31 {strides = array<i32>} : memref<72x128xf32, #tpu.memory_space<vmem>>, vector<8x128xf32>,
    %c1_i32 = arith.constant 1 : i32
    %33 = tpu.dynamic_rotate %14 by %c1_i32 dim 1 : vector<8x128xf32>, i32 -> vector<8x128xf32>
    %c3 = arith.constant 3 : index
    %c0_21 = arith.constant 0 : index
    %c0_22 = arith.constant 0 : index
    %34 = vector.load %arg2[%c3, %c0_21, %c0_22] : memref<9x1x128xf32, #tpu.memory_space<vmem>>, vector<1x1x128xf32>
    %35 = vector.shape_cast %34 : vector<1x1x128xf32> to vector<1x128xf32>
    %36 = vector.broadcast %35 : vector<1x128xf32> to vector<8x128xf32>
    %37 = arith.mulf %33, %36 : vector<8x128xf32>
    %c24 = arith.constant 24 : index
    %c0_23 = arith.constant 0 : index
    %38 = vector.load %arg11[%c24, %c0_23] : memref<72x128xf32, #tpu.memory_space<vmem>>, vector<8x128xf32>
    tpu.vector_store %arg11[%c24, %c0_23], %37 {strides = array<i32>} : memref<72x128xf32, #tpu.memory_space<vmem>>, vector<8x128xf32>,
    %c32 = arith.constant 32 : index
    %c0_24 = arith.constant 0 : index
    %39 = vector.load %arg11[%c32, %c0_24] : memref<72x128xf32, #tpu.memory_space<vmem>>, vector<8x128xf32>
    tpu.vector_store %arg11[%c32, %c0_24], %14 {strides = array<i32>} : memref<72x128xf32, #tpu.memory_space<vmem>>, vector<8x128xf32>,
    %c127_i32 = arith.constant 127 : i32
    %40 = tpu.dynamic_rotate %14 by %c127_i32 dim 1 : vector<8x128xf32>, i32 -> vector<8x128xf32>
    %c5 = arith.constant 5 : index
    %c0_25 = arith.constant 0 : index
    %c0_26 = arith.constant 0 : index
    %41 = vector.load %arg2[%c5, %c0_25, %c0_26] : memref<9x1x128xf32, #tpu.memory_space<vmem>>, vector<1x1x128xf32>
    %42 = vector.shape_cast %41 : vector<1x1x128xf32> to vector<1x128xf32>
    %43 = vector.broadcast %42 : vector<1x128xf32> to vector<8x128xf32>
    %44 = arith.mulf %40, %43 : vector<8x128xf32>
    %c40 = arith.constant 40 : index
    %c0_27 = arith.constant 0 : index
    %45 = vector.load %arg11[%c40, %c0_27] : memref<72x128xf32, #tpu.memory_space<vmem>>, vector<8x128xf32>
    tpu.vector_store %arg11[%c40, %c0_27], %44 {strides = array<i32>} : memref<72x128xf32, #tpu.memory_space<vmem>>, vector<8x128xf32>,
    %c121_i32 = arith.constant 121 : i32
    %46 = tpu.dynamic_rotate %14 by %c121_i32 dim 1 : vector<8x128xf32>, i32 -> vector<8x128xf32>
    %c6 = arith.constant 6 : index
    %c0_28 = arith.constant 0 : index
    %c0_29 = arith.constant 0 : index
    %47 = vector.load %arg2[%c6, %c0_28, %c0_29] : memref<9x1x128xf32, #tpu.memory_space<vmem>>, vector<1x1x128xf32>
    %48 = vector.shape_cast %47 : vector<1x1x128xf32> to vector<1x128xf32>
    %49 = vector.broadcast %48 : vector<1x128xf32> to vector<8x128xf32>
    %50 = arith.mulf %46, %49 : vector<8x128xf32>
    %c48 = arith.constant 48 : index
    %c0_30 = arith.constant 0 : index
    %51 = vector.load %arg11[%c48, %c0_30] : memref<72x128xf32, #tpu.memory_space<vmem>>, vector<8x128xf32>
    tpu.vector_store %arg11[%c48, %c0_30], %50 {strides = array<i32>} : memref<72x128xf32, #tpu.memory_space<vmem>>, vector<8x128xf32>,
    %c120_i32 = arith.constant 120 : i32
    %52 = tpu.dynamic_rotate %14 by %c120_i32 dim 1 : vector<8x128xf32>, i32 -> vector<8x128xf32>
    %c7 = arith.constant 7 : index
    %c0_31 = arith.constant 0 : index
    %c0_32 = arith.constant 0 : index
    %53 = vector.load %arg2[%c7, %c0_31, %c0_32] : memref<9x1x128xf32, #tpu.memory_space<vmem>>, vector<1x1x128xf32>
    %54 = vector.shape_cast %53 : vector<1x1x128xf32> to vector<1x128xf32>
    %55 = vector.broadcast %54 : vector<1x128xf32> to vector<8x128xf32>
    %56 = arith.mulf %52, %55 : vector<8x128xf32>
    %c56 = arith.constant 56 : index
    %c0_33 = arith.constant 0 : index
    %57 = vector.load %arg11[%c56, %c0_33] : memref<72x128xf32, #tpu.memory_space<vmem>>, vector<8x128xf32>
    tpu.vector_store %arg11[%c56, %c0_33], %56 {strides = array<i32>} : memref<72x128xf32, #tpu.memory_space<vmem>>, vector<8x128xf32>,
    %c119_i32 = arith.constant 119 : i32
    %58 = tpu.dynamic_rotate %14 by %c119_i32 dim 1 : vector<8x128xf32>, i32 -> vector<8x128xf32>
    %c8_34 = arith.constant 8 : index
    %c0_35 = arith.constant 0 : index
    %c0_36 = arith.constant 0 : index
    %59 = vector.load %arg2[%c8_34, %c0_35, %c0_36] : memref<9x1x128xf32, #tpu.memory_space<vmem>>, vector<1x1x128xf32>
    %60 = vector.shape_cast %59 : vector<1x1x128xf32> to vector<1x128xf32>
    %61 = vector.broadcast %60 : vector<1x128xf32> to vector<8x128xf32>
    %62 = arith.mulf %58, %61 : vector<8x128xf32>
    %c64 = arith.constant 64 : index
    %c0_37 = arith.constant 0 : index
    %63 = vector.load %arg11[%c64, %c0_37] : memref<72x128xf32, #tpu.memory_space<vmem>>, vector<8x128xf32>
    tpu.vector_store %arg11[%c64, %c0_37], %62 {strides = array<i32>} : memref<72x128xf32, #tpu.memory_space<vmem>>, vector<8x128xf32>,
    %c0_38 = arith.constant 0 : index
    %c0_39 = arith.constant 0 : index
    %c0_40 = arith.constant 0 : index
    %64 = vector.load %arg5[%c0_38, %c0_39, %c0_40] : memref<4x2x72xbf16, #tpu.memory_space<vmem>>, vector<1x2x72xbf16>
    %65 = vector.shape_cast %64 : vector<1x2x72xbf16> to vector<2x72xbf16>
    %c0_41 = arith.constant 0 : index
    %c0_42 = arith.constant 0 : index
    %66 = vector.load %arg11[%c0_41, %c0_42] : memref<72x128xf32, #tpu.memory_space<vmem>>, vector<72x128xf32>
    %67 = arith.truncf %66 : vector<72x128xf32> to vector<72x128xbf16>
    %cst_43 = arith.constant dense<0.000000e+00> : vector<2x128xf32>
    %68 = tpu.matmul %65, %67, %cst_43 {dimension_numbers = #tpu.dot_dimension_numbers<[1], [0], [0], [1], [0, 0, 1, 1], [], []>} : vector<2x72xbf16>, vector<72x128xbf16>, vector<2x128xf32> -> vector<2x128xf32>
    %c0_44 = arith.constant 0 : index
    %c0_45 = arith.constant 0 : index
    %c0_46 = arith.constant 0 : index
    %69 = vector.load %arg6[%c0_44, %c0_45, %c0_46] : memref<4x2x1xf32, #tpu.memory_space<vmem>>, vector<1x2x1xf32>
    %70 = vector.shape_cast %69 : vector<1x2x1xf32> to vector<2x1xf32>
    %71 = vector.broadcast %70 : vector<2x1xf32> to vector<2x128xf32>
    %72 = arith.addf %68, %71 : vector<2x128xf32>
    %cst_47 = arith.constant 0.000000e+00 : f32
    %73 = vector.broadcast %cst_47 : f32 to vector<2x128xf32>
    %74 = arith.cmpf ogt, %72, %73 : vector<2x128xf32>
    %cst_48 = arith.constant 0.00999999977 : f32
    %75 = vector.broadcast %cst_48 : f32 to vector<2x128xf32>
    %76 = arith.mulf %75, %72 : vector<2x128xf32>
    %77 = arith.select %74, %72, %76 : vector<2x128xi1>, vector<2x128xf32>
    %c0_49 = arith.constant 0 : index
    %c0_50 = arith.constant 0 : index
    %c0_51 = arith.constant 0 : index
    %78 = vector.load %arg9[%c0_49, %c0_50, %c0_51] : memref<4x32x1xf32, #tpu.memory_space<vmem>>, vector<1x32x1xf32>
    %79 = vector.shape_cast %78 : vector<1x32x1xf32> to vector<32x1xf32>
    %80 = vector.broadcast %79 : vector<32x1xf32> to vector<32x128xf32>
    %81 = arith.mulf %80, %1 : vector<32x128xf32>
    %c0_52 = arith.constant 0 : index
    %c0_53 = arith.constant 0 : index
    %c0_54 = arith.constant 0 : index
    %82 = vector.load %arg8[%c0_52, %c0_53, %c0_54] : memref<4x32x1xf32, #tpu.memory_space<vmem>>, vector<1x32x1xf32>
    %83 = vector.shape_cast %82 : vector<1x32x1xf32> to vector<32x1xf32>
    %84 = vector.broadcast %83 : vector<32x1xf32> to vector<32x128xf32>
    %85 = arith.addf %81, %84 : vector<32x128xf32>
    %c0_55 = arith.constant 0 : index
    %c0_56 = arith.constant 0 : index
    %c0_57 = arith.constant 0 : index
    %c0_58 = arith.constant 0 : index
    %86 = vector.load %arg7[%c0_55, %c0_56, %c0_57, %c0_58] : memref<4x2x32x1xf32, #tpu.memory_space<vmem>>, vector<1x1x32x1xf32>
    %87 = vector.shape_cast %86 : vector<1x1x32x1xf32> to vector<32x1xf32>
    %88 = vector.extract_strided_slice %77 {offsets = [0, 0], sizes = [1, 128], strides = [1, 1]} : vector<2x128xf32> to vector<1x128xf32>
    %89 = vector.broadcast %87 : vector<32x1xf32> to vector<32x128xf32>
    %90 = vector.broadcast %88 : vector<1x128xf32> to vector<32x128xf32>
    %91 = arith.mulf %89, %90 : vector<32x128xf32>
    %92 = arith.addf %85, %91 : vector<32x128xf32>
    %c0_59 = arith.constant 0 : index
    %c1_60 = arith.constant 1 : index
    %c0_61 = arith.constant 0 : index
    %c0_62 = arith.constant 0 : index
    %93 = vector.load %arg7[%c0_59, %c1_60, %c0_61, %c0_62] : memref<4x2x32x1xf32, #tpu.memory_space<vmem>>, vector<1x1x32x1xf32>
    %94 = vector.shape_cast %93 : vector<1x1x32x1xf32> to vector<32x1xf32>
    %95 = vector.extract_strided_slice %77 {offsets = [1, 0], sizes = [1, 128], strides = [1, 1]} : vector<2x128xf32> to vector<1x128xf32>
    %96 = vector.broadcast %94 : vector<32x1xf32> to vector<32x128xf32>
    %97 = vector.broadcast %95 : vector<1x128xf32> to vector<32x128xf32>
    %98 = arith.mulf %96, %97 : vector<32x128xf32>
    %99 = arith.addf %92, %98 : vector<32x128xf32>
    %cst_63 = arith.constant 0.000000e+00 : f32
    %100 = vector.broadcast %cst_63 : f32 to vector<32x128xf32>
    %101 = arith.cmpf ogt, %99, %100 : vector<32x128xf32>
    %cst_64 = arith.constant 0.00999999977 : f32
    %102 = vector.broadcast %cst_64 : f32 to vector<32x128xf32>
    %103 = arith.mulf %102, %99 : vector<32x128xf32>
    %104 = arith.select %101, %99, %103 : vector<32x128xi1>, vector<32x128xf32>
    %c1_65 = arith.constant 1 : index
    %c0_66 = arith.constant 0 : index
    %c0_67 = arith.constant 0 : index
    %105 = vector.load %arg3[%c1_65, %c0_66, %c0_67] : memref<4x8x32xbf16, #tpu.memory_space<vmem>>, vector<1x8x32xbf16>
    %106 = vector.shape_cast %105 : vector<1x8x32xbf16> to vector<8x32xbf16>
    %107 = arith.truncf %104 : vector<32x128xf32> to vector<32x128xbf16>
    %cst_68 = arith.constant dense<0.000000e+00> : vector<8x128xf32>
    %108 = tpu.matmul %106, %107, %cst_68 {dimension_numbers = #tpu.dot_dimension_numbers<[1], [0], [0], [1], [0, 0, 1, 1], [], []>} : vector<8x32xbf16>, vector<32x128xbf16>, vector<8x128xf32> -> vector<8x128xf32>
    %c1_69 = arith.constant 1 : index
    %c0_70 = arith.constant 0 : index
    %c0_71 = arith.constant 0 : index
    %109 = vector.load %arg4[%c1_69, %c0_70, %c0_71] : memref<4x8x1xf32, #tpu.memory_space<vmem>>, vector<1x8x1xf32>
    %110 = vector.shape_cast %109 : vector<1x8x1xf32> to vector<8x1xf32>
    %111 = vector.broadcast %110 : vector<8x1xf32> to vector<8x128xf32>
    %112 = arith.addf %108, %111 : vector<8x128xf32>
    %cst_72 = arith.constant 0.000000e+00 : f32
    %113 = vector.broadcast %cst_72 : f32 to vector<8x128xf32>
    %114 = arith.cmpf ogt, %112, %113 : vector<8x128xf32>
    %cst_73 = arith.constant 0.00999999977 : f32
    %115 = vector.broadcast %cst_73 : f32 to vector<8x128xf32>
    %116 = arith.mulf %115, %112 : vector<8x128xf32>
    %117 = arith.select %114, %112, %116 : vector<8x128xi1>, vector<8x128xf32>
    %c9_i32_74 = arith.constant 9 : i32
    %118 = tpu.dynamic_rotate %117 by %c9_i32_74 dim 1 : vector<8x128xf32>, i32 -> vector<8x128xf32>
    %c0_75 = arith.constant 0 : index
    %c0_76 = arith.constant 0 : index
    %c0_77 = arith.constant 0 : index
    %119 = vector.load %arg2[%c0_75, %c0_76, %c0_77] : memref<9x1x128xf32, #tpu.memory_space<vmem>>, vector<1x1x128xf32>
    %120 = vector.shape_cast %119 : vector<1x1x128xf32> to vector<1x128xf32>
    %121 = vector.broadcast %120 : vector<1x128xf32> to vector<8x128xf32>
    %122 = arith.mulf %118, %121 : vector<8x128xf32>
    %c0_78 = arith.constant 0 : index
    %c0_79 = arith.constant 0 : index
    %123 = vector.load %arg11[%c0_78, %c0_79] : memref<72x128xf32, #tpu.memory_space<vmem>>, vector<8x128xf32>
    tpu.vector_store %arg11[%c0_78, %c0_79], %122 {strides = array<i32>} : memref<72x128xf32, #tpu.memory_space<vmem>>, vector<8x128xf32>,
    %c8_i32_80 = arith.constant 8 : i32
    %124 = tpu.dynamic_rotate %117 by %c8_i32_80 dim 1 : vector<8x128xf32>, i32 -> vector<8x128xf32>
    %c1_81 = arith.constant 1 : index
    %c0_82 = arith.constant 0 : index
    %c0_83 = arith.constant 0 : index
    %125 = vector.load %arg2[%c1_81, %c0_82, %c0_83] : memref<9x1x128xf32, #tpu.memory_space<vmem>>, vector<1x1x128xf32>
    %126 = vector.shape_cast %125 : vector<1x1x128xf32> to vector<1x128xf32>
    %127 = vector.broadcast %126 : vector<1x128xf32> to vector<8x128xf32>
    %128 = arith.mulf %124, %127 : vector<8x128xf32>
    %c8_84 = arith.constant 8 : index
    %c0_85 = arith.constant 0 : index
    %129 = vector.load %arg11[%c8_84, %c0_85] : memref<72x128xf32, #tpu.memory_space<vmem>>, vector<8x128xf32>
    tpu.vector_store %arg11[%c8_84, %c0_85], %128 {strides = array<i32>} : memref<72x128xf32, #tpu.memory_space<vmem>>, vector<8x128xf32>,
    %c7_i32_86 = arith.constant 7 : i32
    %130 = tpu.dynamic_rotate %117 by %c7_i32_86 dim 1 : vector<8x128xf32>, i32 -> vector<8x128xf32>
    %c2_87 = arith.constant 2 : index
    %c0_88 = arith.constant 0 : index
    %c0_89 = arith.constant 0 : index
    %131 = vector.load %arg2[%c2_87, %c0_88, %c0_89] : memref<9x1x128xf32, #tpu.memory_space<vmem>>, vector<1x1x128xf32>
    %132 = vector.shape_cast %131 : vector<1x1x128xf32> to vector<1x128xf32>
    %133 = vector.broadcast %132 : vector<1x128xf32> to vector<8x128xf32>
    %134 = arith.mulf %130, %133 : vector<8x128xf32>
    %c16_90 = arith.constant 16 : index
    %c0_91 = arith.constant 0 : index
    %135 = vector.load %arg11[%c16_90, %c0_91] : memref<72x128xf32, #tpu.memory_space<vmem>>, vector<8x128xf32>
    tpu.vector_store %arg11[%c16_90, %c0_91], %134 {strides = array<i32>} : memref<72x128xf32, #tpu.memory_space<vmem>>, vector<8x128xf32>,
    %c1_i32_92 = arith.constant 1 : i32
    %136 = tpu.dynamic_rotate %117 by %c1_i32_92 dim 1 : vector<8x128xf32>, i32 -> vector<8x128xf32>
    %c3_93 = arith.constant 3 : index
    %c0_94 = arith.constant 0 : index
    %c0_95 = arith.constant 0 : index
    %137 = vector.load %arg2[%c3_93, %c0_94, %c0_95] : memref<9x1x128xf32, #tpu.memory_space<vmem>>, vector<1x1x128xf32>
    %138 = vector.shape_cast %137 : vector<1x1x128xf32> to vector<1x128xf32>
    %139 = vector.broadcast %138 : vector<1x128xf32> to vector<8x128xf32>
    %140 = arith.mulf %136, %139 : vector<8x128xf32>
    %c24_96 = arith.constant 24 : index
    %c0_97 = arith.constant 0 : index
    %141 = vector.load %arg11[%c24_96, %c0_97] : memref<72x128xf32, #tpu.memory_space<vmem>>, vector<8x128xf32>
    tpu.vector_store %arg11[%c24_96, %c0_97], %140 {strides = array<i32>} : memref<72x128xf32, #tpu.memory_space<vmem>>, vector<8x128xf32>,
    %c32_98 = arith.constant 32 : index
    %c0_99 = arith.constant 0 : index
    %142 = vector.load %arg11[%c32_98, %c0_99] : memref<72x128xf32, #tpu.memory_space<vmem>>, vector<8x128xf32>
    tpu.vector_store %arg11[%c32_98, %c0_99], %117 {strides = array<i32>} : memref<72x128xf32, #tpu.memory_space<vmem>>, vector<8x128xf32>,
    %c127_i32_100 = arith.constant 127 : i32
    %143 = tpu.dynamic_rotate %117 by %c127_i32_100 dim 1 : vector<8x128xf32>, i32 -> vector<8x128xf32>
    %c5_101 = arith.constant 5 : index
    %c0_102 = arith.constant 0 : index
    %c0_103 = arith.constant 0 : index
    %144 = vector.load %arg2[%c5_101, %c0_102, %c0_103] : memref<9x1x128xf32, #tpu.memory_space<vmem>>, vector<1x1x128xf32>
    %145 = vector.shape_cast %144 : vector<1x1x128xf32> to vector<1x128xf32>
    %146 = vector.broadcast %145 : vector<1x128xf32> to vector<8x128xf32>
    %147 = arith.mulf %143, %146 : vector<8x128xf32>
    %c40_104 = arith.constant 40 : index
    %c0_105 = arith.constant 0 : index
    %148 = vector.load %arg11[%c40_104, %c0_105] : memref<72x128xf32, #tpu.memory_space<vmem>>, vector<8x128xf32>
    tpu.vector_store %arg11[%c40_104, %c0_105], %147 {strides = array<i32>} : memref<72x128xf32, #tpu.memory_space<vmem>>, vector<8x128xf32>,
    %c121_i32_106 = arith.constant 121 : i32
    %149 = tpu.dynamic_rotate %117 by %c121_i32_106 dim 1 : vector<8x128xf32>, i32 -> vector<8x128xf32>
    %c6_107 = arith.constant 6 : index
    %c0_108 = arith.constant 0 : index
    %c0_109 = arith.constant 0 : index
    %150 = vector.load %arg2[%c6_107, %c0_108, %c0_109] : memref<9x1x128xf32, #tpu.memory_space<vmem>>, vector<1x1x128xf32>
    %151 = vector.shape_cast %150 : vector<1x1x128xf32> to vector<1x128xf32>
    %152 = vector.broadcast %151 : vector<1x128xf32> to vector<8x128xf32>
    %153 = arith.mulf %149, %152 : vector<8x128xf32>
    %c48_110 = arith.constant 48 : index
    %c0_111 = arith.constant 0 : index
    %154 = vector.load %arg11[%c48_110, %c0_111] : memref<72x128xf32, #tpu.memory_space<vmem>>, vector<8x128xf32>
    tpu.vector_store %arg11[%c48_110, %c0_111], %153 {strides = array<i32>} : memref<72x128xf32, #tpu.memory_space<vmem>>, vector<8x128xf32>,
    %c120_i32_112 = arith.constant 120 : i32
    %155 = tpu.dynamic_rotate %117 by %c120_i32_112 dim 1 : vector<8x128xf32>, i32 -> vector<8x128xf32>
    %c7_113 = arith.constant 7 : index
    %c0_114 = arith.constant 0 : index
    %c0_115 = arith.constant 0 : index
    %156 = vector.load %arg2[%c7_113, %c0_114, %c0_115] : memref<9x1x128xf32, #tpu.memory_space<vmem>>, vector<1x1x128xf32>
    %157 = vector.shape_cast %156 : vector<1x1x128xf32> to vector<1x128xf32>
    %158 = vector.broadcast %157 : vector<1x128xf32> to vector<8x128xf32>
    %159 = arith.mulf %155, %158 : vector<8x128xf32>
    %c56_116 = arith.constant 56 : index
    %c0_117 = arith.constant 0 : index
    %160 = vector.load %arg11[%c56_116, %c0_117] : memref<72x128xf32, #tpu.memory_space<vmem>>, vector<8x128xf32>
    tpu.vector_store %arg11[%c56_116, %c0_117], %159 {strides = array<i32>} : memref<72x128xf32, #tpu.memory_space<vmem>>, vector<8x128xf32>,
    %c119_i32_118 = arith.constant 119 : i32
    %161 = tpu.dynamic_rotate %117 by %c119_i32_118 dim 1 : vector<8x128xf32>, i32 -> vector<8x128xf32>
    %c8_119 = arith.constant 8 : index
    %c0_120 = arith.constant 0 : index
    %c0_121 = arith.constant 0 : index
    %162 = vector.load %arg2[%c8_119, %c0_120, %c0_121] : memref<9x1x128xf32, #tpu.memory_space<vmem>>, vector<1x1x128xf32>
    %163 = vector.shape_cast %162 : vector<1x1x128xf32> to vector<1x128xf32>
    %164 = vector.broadcast %163 : vector<1x128xf32> to vector<8x128xf32>
    %165 = arith.mulf %161, %164 : vector<8x128xf32>
    %c64_122 = arith.constant 64 : index
    %c0_123 = arith.constant 0 : index
    %166 = vector.load %arg11[%c64_122, %c0_123] : memref<72x128xf32, #tpu.memory_space<vmem>>, vector<8x128xf32>
    tpu.vector_store %arg11[%c64_122, %c0_123], %165 {strides = array<i32>} : memref<72x128xf32, #tpu.memory_space<vmem>>, vector<8x128xf32>,
    %c1_124 = arith.constant 1 : index
    %c0_125 = arith.constant 0 : index
    %c0_126 = arith.constant 0 : index
    %167 = vector.load %arg5[%c1_124, %c0_125, %c0_126] : memref<4x2x72xbf16, #tpu.memory_space<vmem>>, vector<1x2x72xbf16>
    %168 = vector.shape_cast %167 : vector<1x2x72xbf16> to vector<2x72xbf16>
    %c0_127 = arith.constant 0 : index
    %c0_128 = arith.constant 0 : index
    %169 = vector.load %arg11[%c0_127, %c0_128] : memref<72x128xf32, #tpu.memory_space<vmem>>, vector<72x128xf32>
    %170 = arith.truncf %169 : vector<72x128xf32> to vector<72x128xbf16>
    %cst_129 = arith.constant dense<0.000000e+00> : vector<2x128xf32>
    %171 = tpu.matmul %168, %170, %cst_129 {dimension_numbers = #tpu.dot_dimension_numbers<[1], [0], [0], [1], [0, 0, 1, 1], [], []>} : vector<2x72xbf16>, vector<72x128xbf16>, vector<2x128xf32> -> vector<2x128xf32>
    %c1_130 = arith.constant 1 : index
    %c0_131 = arith.constant 0 : index
    %c0_132 = arith.constant 0 : index
    %172 = vector.load %arg6[%c1_130, %c0_131, %c0_132] : memref<4x2x1xf32, #tpu.memory_space<vmem>>, vector<1x2x1xf32>
    %173 = vector.shape_cast %172 : vector<1x2x1xf32> to vector<2x1xf32>
    %174 = vector.broadcast %173 : vector<2x1xf32> to vector<2x128xf32>
    %175 = arith.addf %171, %174 : vector<2x128xf32>
    %cst_133 = arith.constant 0.000000e+00 : f32
    %176 = vector.broadcast %cst_133 : f32 to vector<2x128xf32>
    %177 = arith.cmpf ogt, %175, %176 : vector<2x128xf32>
    %cst_134 = arith.constant 0.00999999977 : f32
    %178 = vector.broadcast %cst_134 : f32 to vector<2x128xf32>
    %179 = arith.mulf %178, %175 : vector<2x128xf32>
    %180 = arith.select %177, %175, %179 : vector<2x128xi1>, vector<2x128xf32>
    %c1_135 = arith.constant 1 : index
    %c0_136 = arith.constant 0 : index
    %c0_137 = arith.constant 0 : index
    %181 = vector.load %arg9[%c1_135, %c0_136, %c0_137] : memref<4x32x1xf32, #tpu.memory_space<vmem>>, vector<1x32x1xf32>
    %182 = vector.shape_cast %181 : vector<1x32x1xf32> to vector<32x1xf32>
    %183 = vector.broadcast %182 : vector<32x1xf32> to vector<32x128xf32>
    %184 = arith.mulf %183, %104 : vector<32x128xf32>
    %c1_138 = arith.constant 1 : index
    %c0_139 = arith.constant 0 : index
    %c0_140 = arith.constant 0 : index
    %185 = vector.load %arg8[%c1_138, %c0_139, %c0_140] : memref<4x32x1xf32, #tpu.memory_space<vmem>>, vector<1x32x1xf32>
    %186 = vector.shape_cast %185 : vector<1x32x1xf32> to vector<32x1xf32>
    %187 = vector.broadcast %186 : vector<32x1xf32> to vector<32x128xf32>
    %188 = arith.addf %184, %187 : vector<32x128xf32>
    %c1_141 = arith.constant 1 : index
    %c0_142 = arith.constant 0 : index
    %c0_143 = arith.constant 0 : index
    %c0_144 = arith.constant 0 : index
    %189 = vector.load %arg7[%c1_141, %c0_142, %c0_143, %c0_144] : memref<4x2x32x1xf32, #tpu.memory_space<vmem>>, vector<1x1x32x1xf32>
    %190 = vector.shape_cast %189 : vector<1x1x32x1xf32> to vector<32x1xf32>
    %191 = vector.extract_strided_slice %180 {offsets = [0, 0], sizes = [1, 128], strides = [1, 1]} : vector<2x128xf32> to vector<1x128xf32>
    %192 = vector.broadcast %190 : vector<32x1xf32> to vector<32x128xf32>
    %193 = vector.broadcast %191 : vector<1x128xf32> to vector<32x128xf32>
    %194 = arith.mulf %192, %193 : vector<32x128xf32>
    %195 = arith.addf %188, %194 : vector<32x128xf32>
    %c1_145 = arith.constant 1 : index
    %c1_146 = arith.constant 1 : index
    %c0_147 = arith.constant 0 : index
    %c0_148 = arith.constant 0 : index
    %196 = vector.load %arg7[%c1_145, %c1_146, %c0_147, %c0_148] : memref<4x2x32x1xf32, #tpu.memory_space<vmem>>, vector<1x1x32x1xf32>
    %197 = vector.shape_cast %196 : vector<1x1x32x1xf32> to vector<32x1xf32>
    %198 = vector.extract_strided_slice %180 {offsets = [1, 0], sizes = [1, 128], strides = [1, 1]} : vector<2x128xf32> to vector<1x128xf32>
    %199 = vector.broadcast %197 : vector<32x1xf32> to vector<32x128xf32>
    %200 = vector.broadcast %198 : vector<1x128xf32> to vector<32x128xf32>
    %201 = arith.mulf %199, %200 : vector<32x128xf32>
    %202 = arith.addf %195, %201 : vector<32x128xf32>
    %cst_149 = arith.constant 0.000000e+00 : f32
    %203 = vector.broadcast %cst_149 : f32 to vector<32x128xf32>
    %204 = arith.cmpf ogt, %202, %203 : vector<32x128xf32>
    %cst_150 = arith.constant 0.00999999977 : f32
    %205 = vector.broadcast %cst_150 : f32 to vector<32x128xf32>
    %206 = arith.mulf %205, %202 : vector<32x128xf32>
    %207 = arith.select %204, %202, %206 : vector<32x128xi1>, vector<32x128xf32>
    %c2_151 = arith.constant 2 : index
    %c0_152 = arith.constant 0 : index
    %c0_153 = arith.constant 0 : index
    %208 = vector.load %arg3[%c2_151, %c0_152, %c0_153] : memref<4x8x32xbf16, #tpu.memory_space<vmem>>, vector<1x8x32xbf16>
    %209 = vector.shape_cast %208 : vector<1x8x32xbf16> to vector<8x32xbf16>
    %210 = arith.truncf %207 : vector<32x128xf32> to vector<32x128xbf16>
    %cst_154 = arith.constant dense<0.000000e+00> : vector<8x128xf32>
    %211 = tpu.matmul %209, %210, %cst_154 {dimension_numbers = #tpu.dot_dimension_numbers<[1], [0], [0], [1], [0, 0, 1, 1], [], []>} : vector<8x32xbf16>, vector<32x128xbf16>, vector<8x128xf32> -> vector<8x128xf32>
    %c2_155 = arith.constant 2 : index
    %c0_156 = arith.constant 0 : index
    %c0_157 = arith.constant 0 : index
    %212 = vector.load %arg4[%c2_155, %c0_156, %c0_157] : memref<4x8x1xf32, #tpu.memory_space<vmem>>, vector<1x8x1xf32>
    %213 = vector.shape_cast %212 : vector<1x8x1xf32> to vector<8x1xf32>
    %214 = vector.broadcast %213 : vector<8x1xf32> to vector<8x128xf32>
    %215 = arith.addf %211, %214 : vector<8x128xf32>
    %cst_158 = arith.constant 0.000000e+00 : f32
    %216 = vector.broadcast %cst_158 : f32 to vector<8x128xf32>
    %217 = arith.cmpf ogt, %215, %216 : vector<8x128xf32>
    %cst_159 = arith.constant 0.00999999977 : f32
    %218 = vector.broadcast %cst_159 : f32 to vector<8x128xf32>
    %219 = arith.mulf %218, %215 : vector<8x128xf32>
    %220 = arith.select %217, %215, %219 : vector<8x128xi1>, vector<8x128xf32>
    %c9_i32_160 = arith.constant 9 : i32
    %221 = tpu.dynamic_rotate %220 by %c9_i32_160 dim 1 : vector<8x128xf32>, i32 -> vector<8x128xf32>
    %c0_161 = arith.constant 0 : index
    %c0_162 = arith.constant 0 : index
    %c0_163 = arith.constant 0 : index
    %222 = vector.load %arg2[%c0_161, %c0_162, %c0_163] : memref<9x1x128xf32, #tpu.memory_space<vmem>>, vector<1x1x128xf32>
    %223 = vector.shape_cast %222 : vector<1x1x128xf32> to vector<1x128xf32>
    %224 = vector.broadcast %223 : vector<1x128xf32> to vector<8x128xf32>
    %225 = arith.mulf %221, %224 : vector<8x128xf32>
    %c0_164 = arith.constant 0 : index
    %c0_165 = arith.constant 0 : index
    %226 = vector.load %arg11[%c0_164, %c0_165] : memref<72x128xf32, #tpu.memory_space<vmem>>, vector<8x128xf32>
    tpu.vector_store %arg11[%c0_164, %c0_165], %225 {strides = array<i32>} : memref<72x128xf32, #tpu.memory_space<vmem>>, vector<8x128xf32>,
    %c8_i32_166 = arith.constant 8 : i32
    %227 = tpu.dynamic_rotate %220 by %c8_i32_166 dim 1 : vector<8x128xf32>, i32 -> vector<8x128xf32>
    %c1_167 = arith.constant 1 : index
    %c0_168 = arith.constant 0 : index
    %c0_169 = arith.constant 0 : index
    %228 = vector.load %arg2[%c1_167, %c0_168, %c0_169] : memref<9x1x128xf32, #tpu.memory_space<vmem>>, vector<1x1x128xf32>
    %229 = vector.shape_cast %228 : vector<1x1x128xf32> to vector<1x128xf32>
    %230 = vector.broadcast %229 : vector<1x128xf32> to vector<8x128xf32>
    %231 = arith.mulf %227, %230 : vector<8x128xf32>
    %c8_170 = arith.constant 8 : index
    %c0_171 = arith.constant 0 : index
    %232 = vector.load %arg11[%c8_170, %c0_171] : memref<72x128xf32, #tpu.memory_space<vmem>>, vector<8x128xf32>
    tpu.vector_store %arg11[%c8_170, %c0_171], %231 {strides = array<i32>} : memref<72x128xf32, #tpu.memory_space<vmem>>, vector<8x128xf32>,
    %c7_i32_172 = arith.constant 7 : i32
    %233 = tpu.dynamic_rotate %220 by %c7_i32_172 dim 1 : vector<8x128xf32>, i32 -> vector<8x128xf32>
    %c2_173 = arith.constant 2 : index
    %c0_174 = arith.constant 0 : index
    %c0_175 = arith.constant 0 : index
    %234 = vector.load %arg2[%c2_173, %c0_174, %c0_175] : memref<9x1x128xf32, #tpu.memory_space<vmem>>, vector<1x1x128xf32>
    %235 = vector.shape_cast %234 : vector<1x1x128xf32> to vector<1x128xf32>
    %236 = vector.broadcast %235 : vector<1x128xf32> to vector<8x128xf32>
    %237 = arith.mulf %233, %236 : vector<8x128xf32>
    %c16_176 = arith.constant 16 : index
    %c0_177 = arith.constant 0 : index
    %238 = vector.load %arg11[%c16_176, %c0_177] : memref<72x128xf32, #tpu.memory_space<vmem>>, vector<8x128xf32>
    tpu.vector_store %arg11[%c16_176, %c0_177], %237 {strides = array<i32>} : memref<72x128xf32, #tpu.memory_space<vmem>>, vector<8x128xf32>,
    %c1_i32_178 = arith.constant 1 : i32
    %239 = tpu.dynamic_rotate %220 by %c1_i32_178 dim 1 : vector<8x128xf32>, i32 -> vector<8x128xf32>
    %c3_179 = arith.constant 3 : index
    %c0_180 = arith.constant 0 : index
    %c0_181 = arith.constant 0 : index
    %240 = vector.load %arg2[%c3_179, %c0_180, %c0_181] : memref<9x1x128xf32, #tpu.memory_space<vmem>>, vector<1x1x128xf32>
    %241 = vector.shape_cast %240 : vector<1x1x128xf32> to vector<1x128xf32>
    %242 = vector.broadcast %241 : vector<1x128xf32> to vector<8x128xf32>
    %243 = arith.mulf %239, %242 : vector<8x128xf32>
    %c24_182 = arith.constant 24 : index
    %c0_183 = arith.constant 0 : index
    %244 = vector.load %arg11[%c24_182, %c0_183] : memref<72x128xf32, #tpu.memory_space<vmem>>, vector<8x128xf32>
    tpu.vector_store %arg11[%c24_182, %c0_183], %243 {strides = array<i32>} : memref<72x128xf32, #tpu.memory_space<vmem>>, vector<8x128xf32>,
    %c32_184 = arith.constant 32 : index
    %c0_185 = arith.constant 0 : index
    %245 = vector.load %arg11[%c32_184, %c0_185] : memref<72x128xf32, #tpu.memory_space<vmem>>, vector<8x128xf32>
    tpu.vector_store %arg11[%c32_184, %c0_185], %220 {strides = array<i32>} : memref<72x128xf32, #tpu.memory_space<vmem>>, vector<8x128xf32>,
    %c127_i32_186 = arith.constant 127 : i32
    %246 = tpu.dynamic_rotate %220 by %c127_i32_186 dim 1 : vector<8x128xf32>, i32 -> vector<8x128xf32>
    %c5_187 = arith.constant 5 : index
    %c0_188 = arith.constant 0 : index
    %c0_189 = arith.constant 0 : index
    %247 = vector.load %arg2[%c5_187, %c0_188, %c0_189] : memref<9x1x128xf32, #tpu.memory_space<vmem>>, vector<1x1x128xf32>
    %248 = vector.shape_cast %247 : vector<1x1x128xf32> to vector<1x128xf32>
    %249 = vector.broadcast %248 : vector<1x128xf32> to vector<8x128xf32>
    %250 = arith.mulf %246, %249 : vector<8x128xf32>
    %c40_190 = arith.constant 40 : index
    %c0_191 = arith.constant 0 : index
    %251 = vector.load %arg11[%c40_190, %c0_191] : memref<72x128xf32, #tpu.memory_space<vmem>>, vector<8x128xf32>
    tpu.vector_store %arg11[%c40_190, %c0_191], %250 {strides = array<i32>} : memref<72x128xf32, #tpu.memory_space<vmem>>, vector<8x128xf32>,
    %c121_i32_192 = arith.constant 121 : i32
    %252 = tpu.dynamic_rotate %220 by %c121_i32_192 dim 1 : vector<8x128xf32>, i32 -> vector<8x128xf32>
    %c6_193 = arith.constant 6 : index
    %c0_194 = arith.constant 0 : index
    %c0_195 = arith.constant 0 : index
    %253 = vector.load %arg2[%c6_193, %c0_194, %c0_195] : memref<9x1x128xf32, #tpu.memory_space<vmem>>, vector<1x1x128xf32>
    %254 = vector.shape_cast %253 : vector<1x1x128xf32> to vector<1x128xf32>
    %255 = vector.broadcast %254 : vector<1x128xf32> to vector<8x128xf32>
    %256 = arith.mulf %252, %255 : vector<8x128xf32>
    %c48_196 = arith.constant 48 : index
    %c0_197 = arith.constant 0 : index
    %257 = vector.load %arg11[%c48_196, %c0_197] : memref<72x128xf32, #tpu.memory_space<vmem>>, vector<8x128xf32>
    tpu.vector_store %arg11[%c48_196, %c0_197], %256 {strides = array<i32>} : memref<72x128xf32, #tpu.memory_space<vmem>>, vector<8x128xf32>,
    %c120_i32_198 = arith.constant 120 : i32
    %258 = tpu.dynamic_rotate %220 by %c120_i32_198 dim 1 : vector<8x128xf32>, i32 -> vector<8x128xf32>
    %c7_199 = arith.constant 7 : index
    %c0_200 = arith.constant 0 : index
    %c0_201 = arith.constant 0 : index
    %259 = vector.load %arg2[%c7_199, %c0_200, %c0_201] : memref<9x1x128xf32, #tpu.memory_space<vmem>>, vector<1x1x128xf32>
    %260 = vector.shape_cast %259 : vector<1x1x128xf32> to vector<1x128xf32>
    %261 = vector.broadcast %260 : vector<1x128xf32> to vector<8x128xf32>
    %262 = arith.mulf %258, %261 : vector<8x128xf32>
    %c56_202 = arith.constant 56 : index
    %c0_203 = arith.constant 0 : index
    %263 = vector.load %arg11[%c56_202, %c0_203] : memref<72x128xf32, #tpu.memory_space<vmem>>, vector<8x128xf32>
    tpu.vector_store %arg11[%c56_202, %c0_203], %262 {strides = array<i32>} : memref<72x128xf32, #tpu.memory_space<vmem>>, vector<8x128xf32>,
    %c119_i32_204 = arith.constant 119 : i32
    %264 = tpu.dynamic_rotate %220 by %c119_i32_204 dim 1 : vector<8x128xf32>, i32 -> vector<8x128xf32>
    %c8_205 = arith.constant 8 : index
    %c0_206 = arith.constant 0 : index
    %c0_207 = arith.constant 0 : index
    %265 = vector.load %arg2[%c8_205, %c0_206, %c0_207] : memref<9x1x128xf32, #tpu.memory_space<vmem>>, vector<1x1x128xf32>
    %266 = vector.shape_cast %265 : vector<1x1x128xf32> to vector<1x128xf32>
    %267 = vector.broadcast %266 : vector<1x128xf32> to vector<8x128xf32>
    %268 = arith.mulf %264, %267 : vector<8x128xf32>
    %c64_208 = arith.constant 64 : index
    %c0_209 = arith.constant 0 : index
    %269 = vector.load %arg11[%c64_208, %c0_209] : memref<72x128xf32, #tpu.memory_space<vmem>>, vector<8x128xf32>
    tpu.vector_store %arg11[%c64_208, %c0_209], %268 {strides = array<i32>} : memref<72x128xf32, #tpu.memory_space<vmem>>, vector<8x128xf32>,
    %c2_210 = arith.constant 2 : index
    %c0_211 = arith.constant 0 : index
    %c0_212 = arith.constant 0 : index
    %270 = vector.load %arg5[%c2_210, %c0_211, %c0_212] : memref<4x2x72xbf16, #tpu.memory_space<vmem>>, vector<1x2x72xbf16>
    %271 = vector.shape_cast %270 : vector<1x2x72xbf16> to vector<2x72xbf16>
    %c0_213 = arith.constant 0 : index
    %c0_214 = arith.constant 0 : index
    %272 = vector.load %arg11[%c0_213, %c0_214] : memref<72x128xf32, #tpu.memory_space<vmem>>, vector<72x128xf32>
    %273 = arith.truncf %272 : vector<72x128xf32> to vector<72x128xbf16>
    %cst_215 = arith.constant dense<0.000000e+00> : vector<2x128xf32>
    %274 = tpu.matmul %271, %273, %cst_215 {dimension_numbers = #tpu.dot_dimension_numbers<[1], [0], [0], [1], [0, 0, 1, 1], [], []>} : vector<2x72xbf16>, vector<72x128xbf16>, vector<2x128xf32> -> vector<2x128xf32>
    %c2_216 = arith.constant 2 : index
    %c0_217 = arith.constant 0 : index
    %c0_218 = arith.constant 0 : index
    %275 = vector.load %arg6[%c2_216, %c0_217, %c0_218] : memref<4x2x1xf32, #tpu.memory_space<vmem>>, vector<1x2x1xf32>
    %276 = vector.shape_cast %275 : vector<1x2x1xf32> to vector<2x1xf32>
    %277 = vector.broadcast %276 : vector<2x1xf32> to vector<2x128xf32>
    %278 = arith.addf %274, %277 : vector<2x128xf32>
    %cst_219 = arith.constant 0.000000e+00 : f32
    %279 = vector.broadcast %cst_219 : f32 to vector<2x128xf32>
    %280 = arith.cmpf ogt, %278, %279 : vector<2x128xf32>
    %cst_220 = arith.constant 0.00999999977 : f32
    %281 = vector.broadcast %cst_220 : f32 to vector<2x128xf32>
    %282 = arith.mulf %281, %278 : vector<2x128xf32>
    %283 = arith.select %280, %278, %282 : vector<2x128xi1>, vector<2x128xf32>
    %c2_221 = arith.constant 2 : index
    %c0_222 = arith.constant 0 : index
    %c0_223 = arith.constant 0 : index
    %284 = vector.load %arg9[%c2_221, %c0_222, %c0_223] : memref<4x32x1xf32, #tpu.memory_space<vmem>>, vector<1x32x1xf32>
    %285 = vector.shape_cast %284 : vector<1x32x1xf32> to vector<32x1xf32>
    %286 = vector.broadcast %285 : vector<32x1xf32> to vector<32x128xf32>
    %287 = arith.mulf %286, %207 : vector<32x128xf32>
    %c2_224 = arith.constant 2 : index
    %c0_225 = arith.constant 0 : index
    %c0_226 = arith.constant 0 : index
    %288 = vector.load %arg8[%c2_224, %c0_225, %c0_226] : memref<4x32x1xf32, #tpu.memory_space<vmem>>, vector<1x32x1xf32>
    %289 = vector.shape_cast %288 : vector<1x32x1xf32> to vector<32x1xf32>
    %290 = vector.broadcast %289 : vector<32x1xf32> to vector<32x128xf32>
    %291 = arith.addf %287, %290 : vector<32x128xf32>
    %c2_227 = arith.constant 2 : index
    %c0_228 = arith.constant 0 : index
    %c0_229 = arith.constant 0 : index
    %c0_230 = arith.constant 0 : index
    %292 = vector.load %arg7[%c2_227, %c0_228, %c0_229, %c0_230] : memref<4x2x32x1xf32, #tpu.memory_space<vmem>>, vector<1x1x32x1xf32>
    %293 = vector.shape_cast %292 : vector<1x1x32x1xf32> to vector<32x1xf32>
    %294 = vector.extract_strided_slice %283 {offsets = [0, 0], sizes = [1, 128], strides = [1, 1]} : vector<2x128xf32> to vector<1x128xf32>
    %295 = vector.broadcast %293 : vector<32x1xf32> to vector<32x128xf32>
    %296 = vector.broadcast %294 : vector<1x128xf32> to vector<32x128xf32>
    %297 = arith.mulf %295, %296 : vector<32x128xf32>
    %298 = arith.addf %291, %297 : vector<32x128xf32>
    %c2_231 = arith.constant 2 : index
    %c1_232 = arith.constant 1 : index
    %c0_233 = arith.constant 0 : index
    %c0_234 = arith.constant 0 : index
    %299 = vector.load %arg7[%c2_231, %c1_232, %c0_233, %c0_234] : memref<4x2x32x1xf32, #tpu.memory_space<vmem>>, vector<1x1x32x1xf32>
    %300 = vector.shape_cast %299 : vector<1x1x32x1xf32> to vector<32x1xf32>
    %301 = vector.extract_strided_slice %283 {offsets = [1, 0], sizes = [1, 128], strides = [1, 1]} : vector<2x128xf32> to vector<1x128xf32>
    %302 = vector.broadcast %300 : vector<32x1xf32> to vector<32x128xf32>
    %303 = vector.broadcast %301 : vector<1x128xf32> to vector<32x128xf32>
    %304 = arith.mulf %302, %303 : vector<32x128xf32>
    %305 = arith.addf %298, %304 : vector<32x128xf32>
    %cst_235 = arith.constant 0.000000e+00 : f32
    %306 = vector.broadcast %cst_235 : f32 to vector<32x128xf32>
    %307 = arith.cmpf ogt, %305, %306 : vector<32x128xf32>
    %cst_236 = arith.constant 0.00999999977 : f32
    %308 = vector.broadcast %cst_236 : f32 to vector<32x128xf32>
    %309 = arith.mulf %308, %305 : vector<32x128xf32>
    %310 = arith.select %307, %305, %309 : vector<32x128xi1>, vector<32x128xf32>
    %c3_237 = arith.constant 3 : index
    %c0_238 = arith.constant 0 : index
    %c0_239 = arith.constant 0 : index
    %311 = vector.load %arg3[%c3_237, %c0_238, %c0_239] : memref<4x8x32xbf16, #tpu.memory_space<vmem>>, vector<1x8x32xbf16>
    %312 = vector.shape_cast %311 : vector<1x8x32xbf16> to vector<8x32xbf16>
    %313 = arith.truncf %310 : vector<32x128xf32> to vector<32x128xbf16>
    %cst_240 = arith.constant dense<0.000000e+00> : vector<8x128xf32>
    %314 = tpu.matmul %312, %313, %cst_240 {dimension_numbers = #tpu.dot_dimension_numbers<[1], [0], [0], [1], [0, 0, 1, 1], [], []>} : vector<8x32xbf16>, vector<32x128xbf16>, vector<8x128xf32> -> vector<8x128xf32>
    %c3_241 = arith.constant 3 : index
    %c0_242 = arith.constant 0 : index
    %c0_243 = arith.constant 0 : index
    %315 = vector.load %arg4[%c3_241, %c0_242, %c0_243] : memref<4x8x1xf32, #tpu.memory_space<vmem>>, vector<1x8x1xf32>
    %316 = vector.shape_cast %315 : vector<1x8x1xf32> to vector<8x1xf32>
    %317 = vector.broadcast %316 : vector<8x1xf32> to vector<8x128xf32>
    %318 = arith.addf %314, %317 : vector<8x128xf32>
    %cst_244 = arith.constant 0.000000e+00 : f32
    %319 = vector.broadcast %cst_244 : f32 to vector<8x128xf32>
    %320 = arith.cmpf ogt, %318, %319 : vector<8x128xf32>
    %cst_245 = arith.constant 0.00999999977 : f32
    %321 = vector.broadcast %cst_245 : f32 to vector<8x128xf32>
    %322 = arith.mulf %321, %318 : vector<8x128xf32>
    %323 = arith.select %320, %318, %322 : vector<8x128xi1>, vector<8x128xf32>
    %c9_i32_246 = arith.constant 9 : i32
    %324 = tpu.dynamic_rotate %323 by %c9_i32_246 dim 1 : vector<8x128xf32>, i32 -> vector<8x128xf32>
    %c0_247 = arith.constant 0 : index
    %c0_248 = arith.constant 0 : index
    %c0_249 = arith.constant 0 : index
    %325 = vector.load %arg2[%c0_247, %c0_248, %c0_249] : memref<9x1x128xf32, #tpu.memory_space<vmem>>, vector<1x1x128xf32>
    %326 = vector.shape_cast %325 : vector<1x1x128xf32> to vector<1x128xf32>
    %327 = vector.broadcast %326 : vector<1x128xf32> to vector<8x128xf32>
    %328 = arith.mulf %324, %327 : vector<8x128xf32>
    %c0_250 = arith.constant 0 : index
    %c0_251 = arith.constant 0 : index
    %329 = vector.load %arg11[%c0_250, %c0_251] : memref<72x128xf32, #tpu.memory_space<vmem>>, vector<8x128xf32>
    tpu.vector_store %arg11[%c0_250, %c0_251], %328 {strides = array<i32>} : memref<72x128xf32, #tpu.memory_space<vmem>>, vector<8x128xf32>,
    %c8_i32_252 = arith.constant 8 : i32
    %330 = tpu.dynamic_rotate %323 by %c8_i32_252 dim 1 : vector<8x128xf32>, i32 -> vector<8x128xf32>
    %c1_253 = arith.constant 1 : index
    %c0_254 = arith.constant 0 : index
    %c0_255 = arith.constant 0 : index
    %331 = vector.load %arg2[%c1_253, %c0_254, %c0_255] : memref<9x1x128xf32, #tpu.memory_space<vmem>>, vector<1x1x128xf32>
    %332 = vector.shape_cast %331 : vector<1x1x128xf32> to vector<1x128xf32>
    %333 = vector.broadcast %332 : vector<1x128xf32> to vector<8x128xf32>
    %334 = arith.mulf %330, %333 : vector<8x128xf32>
    %c8_256 = arith.constant 8 : index
    %c0_257 = arith.constant 0 : index
    %335 = vector.load %arg11[%c8_256, %c0_257] : memref<72x128xf32, #tpu.memory_space<vmem>>, vector<8x128xf32>
    tpu.vector_store %arg11[%c8_256, %c0_257], %334 {strides = array<i32>} : memref<72x128xf32, #tpu.memory_space<vmem>>, vector<8x128xf32>,
    %c7_i32_258 = arith.constant 7 : i32
    %336 = tpu.dynamic_rotate %323 by %c7_i32_258 dim 1 : vector<8x128xf32>, i32 -> vector<8x128xf32>
    %c2_259 = arith.constant 2 : index
    %c0_260 = arith.constant 0 : index
    %c0_261 = arith.constant 0 : index
    %337 = vector.load %arg2[%c2_259, %c0_260, %c0_261] : memref<9x1x128xf32, #tpu.memory_space<vmem>>, vector<1x1x128xf32>
    %338 = vector.shape_cast %337 : vector<1x1x128xf32> to vector<1x128xf32>
    %339 = vector.broadcast %338 : vector<1x128xf32> to vector<8x128xf32>
    %340 = arith.mulf %336, %339 : vector<8x128xf32>
    %c16_262 = arith.constant 16 : index
    %c0_263 = arith.constant 0 : index
    %341 = vector.load %arg11[%c16_262, %c0_263] : memref<72x128xf32, #tpu.memory_space<vmem>>, vector<8x128xf32>
    tpu.vector_store %arg11[%c16_262, %c0_263], %340 {strides = array<i32>} : memref<72x128xf32, #tpu.memory_space<vmem>>, vector<8x128xf32>,
    %c1_i32_264 = arith.constant 1 : i32
    %342 = tpu.dynamic_rotate %323 by %c1_i32_264 dim 1 : vector<8x128xf32>, i32 -> vector<8x128xf32>
    %c3_265 = arith.constant 3 : index
    %c0_266 = arith.constant 0 : index
    %c0_267 = arith.constant 0 : index
    %343 = vector.load %arg2[%c3_265, %c0_266, %c0_267] : memref<9x1x128xf32, #tpu.memory_space<vmem>>, vector<1x1x128xf32>
    %344 = vector.shape_cast %343 : vector<1x1x128xf32> to vector<1x128xf32>
    %345 = vector.broadcast %344 : vector<1x128xf32> to vector<8x128xf32>
    %346 = arith.mulf %342, %345 : vector<8x128xf32>
    %c24_268 = arith.constant 24 : index
    %c0_269 = arith.constant 0 : index
    %347 = vector.load %arg11[%c24_268, %c0_269] : memref<72x128xf32, #tpu.memory_space<vmem>>, vector<8x128xf32>
    tpu.vector_store %arg11[%c24_268, %c0_269], %346 {strides = array<i32>} : memref<72x128xf32, #tpu.memory_space<vmem>>, vector<8x128xf32>,
    %c32_270 = arith.constant 32 : index
    %c0_271 = arith.constant 0 : index
    %348 = vector.load %arg11[%c32_270, %c0_271] : memref<72x128xf32, #tpu.memory_space<vmem>>, vector<8x128xf32>
    tpu.vector_store %arg11[%c32_270, %c0_271], %323 {strides = array<i32>} : memref<72x128xf32, #tpu.memory_space<vmem>>, vector<8x128xf32>,
    %c127_i32_272 = arith.constant 127 : i32
    %349 = tpu.dynamic_rotate %323 by %c127_i32_272 dim 1 : vector<8x128xf32>, i32 -> vector<8x128xf32>
    %c5_273 = arith.constant 5 : index
    %c0_274 = arith.constant 0 : index
    %c0_275 = arith.constant 0 : index
    %350 = vector.load %arg2[%c5_273, %c0_274, %c0_275] : memref<9x1x128xf32, #tpu.memory_space<vmem>>, vector<1x1x128xf32>
    %351 = vector.shape_cast %350 : vector<1x1x128xf32> to vector<1x128xf32>
    %352 = vector.broadcast %351 : vector<1x128xf32> to vector<8x128xf32>
    %353 = arith.mulf %349, %352 : vector<8x128xf32>
    %c40_276 = arith.constant 40 : index
    %c0_277 = arith.constant 0 : index
    %354 = vector.load %arg11[%c40_276, %c0_277] : memref<72x128xf32, #tpu.memory_space<vmem>>, vector<8x128xf32>
    tpu.vector_store %arg11[%c40_276, %c0_277], %353 {strides = array<i32>} : memref<72x128xf32, #tpu.memory_space<vmem>>, vector<8x128xf32>,
    %c121_i32_278 = arith.constant 121 : i32
    %355 = tpu.dynamic_rotate %323 by %c121_i32_278 dim 1 : vector<8x128xf32>, i32 -> vector<8x128xf32>
    %c6_279 = arith.constant 6 : index
    %c0_280 = arith.constant 0 : index
    %c0_281 = arith.constant 0 : index
    %356 = vector.load %arg2[%c6_279, %c0_280, %c0_281] : memref<9x1x128xf32, #tpu.memory_space<vmem>>, vector<1x1x128xf32>
    %357 = vector.shape_cast %356 : vector<1x1x128xf32> to vector<1x128xf32>
    %358 = vector.broadcast %357 : vector<1x128xf32> to vector<8x128xf32>
    %359 = arith.mulf %355, %358 : vector<8x128xf32>
    %c48_282 = arith.constant 48 : index
    %c0_283 = arith.constant 0 : index
    %360 = vector.load %arg11[%c48_282, %c0_283] : memref<72x128xf32, #tpu.memory_space<vmem>>, vector<8x128xf32>
    tpu.vector_store %arg11[%c48_282, %c0_283], %359 {strides = array<i32>} : memref<72x128xf32, #tpu.memory_space<vmem>>, vector<8x128xf32>,
    %c120_i32_284 = arith.constant 120 : i32
    %361 = tpu.dynamic_rotate %323 by %c120_i32_284 dim 1 : vector<8x128xf32>, i32 -> vector<8x128xf32>
    %c7_285 = arith.constant 7 : index
    %c0_286 = arith.constant 0 : index
    %c0_287 = arith.constant 0 : index
    %362 = vector.load %arg2[%c7_285, %c0_286, %c0_287] : memref<9x1x128xf32, #tpu.memory_space<vmem>>, vector<1x1x128xf32>
    %363 = vector.shape_cast %362 : vector<1x1x128xf32> to vector<1x128xf32>
    %364 = vector.broadcast %363 : vector<1x128xf32> to vector<8x128xf32>
    %365 = arith.mulf %361, %364 : vector<8x128xf32>
    %c56_288 = arith.constant 56 : index
    %c0_289 = arith.constant 0 : index
    %366 = vector.load %arg11[%c56_288, %c0_289] : memref<72x128xf32, #tpu.memory_space<vmem>>, vector<8x128xf32>
    tpu.vector_store %arg11[%c56_288, %c0_289], %365 {strides = array<i32>} : memref<72x128xf32, #tpu.memory_space<vmem>>, vector<8x128xf32>,
    %c119_i32_290 = arith.constant 119 : i32
    %367 = tpu.dynamic_rotate %323 by %c119_i32_290 dim 1 : vector<8x128xf32>, i32 -> vector<8x128xf32>
    %c8_291 = arith.constant 8 : index
    %c0_292 = arith.constant 0 : index
    %c0_293 = arith.constant 0 : index
    %368 = vector.load %arg2[%c8_291, %c0_292, %c0_293] : memref<9x1x128xf32, #tpu.memory_space<vmem>>, vector<1x1x128xf32>
    %369 = vector.shape_cast %368 : vector<1x1x128xf32> to vector<1x128xf32>
    %370 = vector.broadcast %369 : vector<1x128xf32> to vector<8x128xf32>
    %371 = arith.mulf %367, %370 : vector<8x128xf32>
    %c64_294 = arith.constant 64 : index
    %c0_295 = arith.constant 0 : index
    %372 = vector.load %arg11[%c64_294, %c0_295] : memref<72x128xf32, #tpu.memory_space<vmem>>, vector<8x128xf32>
    tpu.vector_store %arg11[%c64_294, %c0_295], %371 {strides = array<i32>} : memref<72x128xf32, #tpu.memory_space<vmem>>, vector<8x128xf32>,
    %c3_296 = arith.constant 3 : index
    %c0_297 = arith.constant 0 : index
    %c0_298 = arith.constant 0 : index
    %373 = vector.load %arg5[%c3_296, %c0_297, %c0_298] : memref<4x2x72xbf16, #tpu.memory_space<vmem>>, vector<1x2x72xbf16>
    %374 = vector.shape_cast %373 : vector<1x2x72xbf16> to vector<2x72xbf16>
    %c0_299 = arith.constant 0 : index
    %c0_300 = arith.constant 0 : index
    %375 = vector.load %arg11[%c0_299, %c0_300] : memref<72x128xf32, #tpu.memory_space<vmem>>, vector<72x128xf32>
    %376 = arith.truncf %375 : vector<72x128xf32> to vector<72x128xbf16>
    %cst_301 = arith.constant dense<0.000000e+00> : vector<2x128xf32>
    %377 = tpu.matmul %374, %376, %cst_301 {dimension_numbers = #tpu.dot_dimension_numbers<[1], [0], [0], [1], [0, 0, 1, 1], [], []>} : vector<2x72xbf16>, vector<72x128xbf16>, vector<2x128xf32> -> vector<2x128xf32>
    %c3_302 = arith.constant 3 : index
    %c0_303 = arith.constant 0 : index
    %c0_304 = arith.constant 0 : index
    %378 = vector.load %arg6[%c3_302, %c0_303, %c0_304] : memref<4x2x1xf32, #tpu.memory_space<vmem>>, vector<1x2x1xf32>
    %379 = vector.shape_cast %378 : vector<1x2x1xf32> to vector<2x1xf32>
    %380 = vector.broadcast %379 : vector<2x1xf32> to vector<2x128xf32>
    %381 = arith.addf %377, %380 : vector<2x128xf32>
    %cst_305 = arith.constant 0.000000e+00 : f32
    %382 = vector.broadcast %cst_305 : f32 to vector<2x128xf32>
    %383 = arith.cmpf ogt, %381, %382 : vector<2x128xf32>
    %cst_306 = arith.constant 0.00999999977 : f32
    %384 = vector.broadcast %cst_306 : f32 to vector<2x128xf32>
    %385 = arith.mulf %384, %381 : vector<2x128xf32>
    %386 = arith.select %383, %381, %385 : vector<2x128xi1>, vector<2x128xf32>
    %c3_307 = arith.constant 3 : index
    %c0_308 = arith.constant 0 : index
    %c0_309 = arith.constant 0 : index
    %387 = vector.load %arg9[%c3_307, %c0_308, %c0_309] : memref<4x32x1xf32, #tpu.memory_space<vmem>>, vector<1x32x1xf32>
    %388 = vector.shape_cast %387 : vector<1x32x1xf32> to vector<32x1xf32>
    %389 = vector.broadcast %388 : vector<32x1xf32> to vector<32x128xf32>
    %390 = arith.mulf %389, %310 : vector<32x128xf32>
    %c3_310 = arith.constant 3 : index
    %c0_311 = arith.constant 0 : index
    %c0_312 = arith.constant 0 : index
    %391 = vector.load %arg8[%c3_310, %c0_311, %c0_312] : memref<4x32x1xf32, #tpu.memory_space<vmem>>, vector<1x32x1xf32>
    %392 = vector.shape_cast %391 : vector<1x32x1xf32> to vector<32x1xf32>
    %393 = vector.broadcast %392 : vector<32x1xf32> to vector<32x128xf32>
    %394 = arith.addf %390, %393 : vector<32x128xf32>
    %c3_313 = arith.constant 3 : index
    %c0_314 = arith.constant 0 : index
    %c0_315 = arith.constant 0 : index
    %c0_316 = arith.constant 0 : index
    %395 = vector.load %arg7[%c3_313, %c0_314, %c0_315, %c0_316] : memref<4x2x32x1xf32, #tpu.memory_space<vmem>>, vector<1x1x32x1xf32>
    %396 = vector.shape_cast %395 : vector<1x1x32x1xf32> to vector<32x1xf32>
    %397 = vector.extract_strided_slice %386 {offsets = [0, 0], sizes = [1, 128], strides = [1, 1]} : vector<2x128xf32> to vector<1x128xf32>
    %398 = vector.broadcast %396 : vector<32x1xf32> to vector<32x128xf32>
    %399 = vector.broadcast %397 : vector<1x128xf32> to vector<32x128xf32>
    %400 = arith.mulf %398, %399 : vector<32x128xf32>
    %401 = arith.addf %394, %400 : vector<32x128xf32>
    %c3_317 = arith.constant 3 : index
    %c1_318 = arith.constant 1 : index
    %c0_319 = arith.constant 0 : index
    %c0_320 = arith.constant 0 : index
    %402 = vector.load %arg7[%c3_317, %c1_318, %c0_319, %c0_320] : memref<4x2x32x1xf32, #tpu.memory_space<vmem>>, vector<1x1x32x1xf32>
    %403 = vector.shape_cast %402 : vector<1x1x32x1xf32> to vector<32x1xf32>
    %404 = vector.extract_strided_slice %386 {offsets = [1, 0], sizes = [1, 128], strides = [1, 1]} : vector<2x128xf32> to vector<1x128xf32>
    %405 = vector.broadcast %403 : vector<32x1xf32> to vector<32x128xf32>
    %406 = vector.broadcast %404 : vector<1x128xf32> to vector<32x128xf32>
    %407 = arith.mulf %405, %406 : vector<32x128xf32>
    %408 = arith.addf %401, %407 : vector<32x128xf32>
    %cst_321 = arith.constant 0.000000e+00 : f32
    %409 = vector.broadcast %cst_321 : f32 to vector<32x128xf32>
    %410 = arith.cmpf ogt, %408, %409 : vector<32x128xf32>
    %cst_322 = arith.constant 0.00999999977 : f32
    %411 = vector.broadcast %cst_322 : f32 to vector<32x128xf32>
    %412 = arith.mulf %411, %408 : vector<32x128xf32>
    %413 = arith.select %410, %408, %412 : vector<32x128xi1>, vector<32x128xf32>
    %c0_323 = arith.constant 0 : index
    %c0_324 = arith.constant 0 : index
    %c0_325 = arith.constant 0 : index
    %414 = vector.load %arg10[%c0_323, %c0_324, %c0_325] : memref<1x32x128xf32, #tpu.memory_space<vmem>>, vector<1x32x128xf32>
    %415 = vector.shape_cast %414 : vector<1x32x128xf32> to vector<32x128xf32>
    %416 = vector.shape_cast %413 : vector<32x128xf32> to vector<1x32x128xf32>
    tpu.vector_store %arg10[%c0_323, %c0_324, %c0_325], %416 {strides = array<i32>} : memref<1x32x128xf32, #tpu.memory_space<vmem>>, vector<1x32x128xf32>,
    return
  }
  func.func @transform_0(%arg0: i32) -> (i32, i32, i32) {
    %c0_i32 = arith.constant 0 : i32
    %c0_i32_0 = arith.constant 0 : i32
    %c0_i32_1 = arith.constant 0 : i32
    return %arg0, %c0_i32, %c0_i32_0 : i32, i32, i32
  }
  func.func @transform_1(%arg0: i32) -> (i32, i32, i32) {
    %c0_i32 = arith.constant 0 : i32
    %c0_i32_0 = arith.constant 0 : i32
    %c0_i32_1 = arith.constant 0 : i32
    %c0_i32_2 = arith.constant 0 : i32
    return %c0_i32, %c0_i32_0, %c0_i32_1 : i32, i32, i32
  }
  func.func @transform_2(%arg0: i32) -> (i32, i32, i32) {
    %c0_i32 = arith.constant 0 : i32
    %c0_i32_0 = arith.constant 0 : i32
    %c0_i32_1 = arith.constant 0 : i32
    %c0_i32_2 = arith.constant 0 : i32
    return %c0_i32, %c0_i32_0, %c0_i32_1 : i32, i32, i32
  }
  func.func @transform_3(%arg0: i32) -> (i32, i32, i32) {
    %c0_i32 = arith.constant 0 : i32
    %c0_i32_0 = arith.constant 0 : i32
    %c0_i32_1 = arith.constant 0 : i32
    %c0_i32_2 = arith.constant 0 : i32
    return %c0_i32, %c0_i32_0, %c0_i32_1 : i32, i32, i32
  }
  func.func @transform_4(%arg0: i32) -> (i32, i32, i32) {
    %c0_i32 = arith.constant 0 : i32
    %c0_i32_0 = arith.constant 0 : i32
    %c0_i32_1 = arith.constant 0 : i32
    %c0_i32_2 = arith.constant 0 : i32
    return %c0_i32, %c0_i32_0, %c0_i32_1 : i32, i32, i32
  }
  func.func @transform_5(%arg0: i32) -> (i32, i32, i32) {
    %c0_i32 = arith.constant 0 : i32
    %c0_i32_0 = arith.constant 0 : i32
    %c0_i32_1 = arith.constant 0 : i32
    %c0_i32_2 = arith.constant 0 : i32
    return %c0_i32, %c0_i32_0, %c0_i32_1 : i32, i32, i32
  }
  func.func @transform_6(%arg0: i32) -> (i32, i32, i32, i32) {
    %c0_i32 = arith.constant 0 : i32
    %c0_i32_0 = arith.constant 0 : i32
    %c0_i32_1 = arith.constant 0 : i32
    %c0_i32_2 = arith.constant 0 : i32
    %c0_i32_3 = arith.constant 0 : i32
    return %c0_i32, %c0_i32_0, %c0_i32_1, %c0_i32_2 : i32, i32, i32, i32
  }
  func.func @transform_7(%arg0: i32) -> (i32, i32, i32) {
    %c0_i32 = arith.constant 0 : i32
    %c0_i32_0 = arith.constant 0 : i32
    %c0_i32_1 = arith.constant 0 : i32
    %c0_i32_2 = arith.constant 0 : i32
    return %c0_i32, %c0_i32_0, %c0_i32_1 : i32, i32, i32
  }
  func.func @transform_8(%arg0: i32) -> (i32, i32, i32) {
    %c0_i32 = arith.constant 0 : i32
    %c0_i32_0 = arith.constant 0 : i32
    %c0_i32_1 = arith.constant 0 : i32
    %c0_i32_2 = arith.constant 0 : i32
    return %c0_i32, %c0_i32_0, %c0_i32_1 : i32, i32, i32
  }
  func.func @transform_9(%arg0: i32) -> (i32, i32, i32) {
    %c0_i32 = arith.constant 0 : i32
    %c0_i32_0 = arith.constant 0 : i32
    %c0_i32_1 = arith.constant 0 : i32
    return %arg0, %c0_i32, %c0_i32_0 : i32, i32, i32
  }
}

</mosaic_0001>

<bundles_post_ra>
// kernel: build_res_block_forward.1
= control target key start
LH: loop header
LB: loop body
LE: loop exit
PB: predicated region body
PF: predicated region fallthrough
CT: control target
= control target key end

     0   :  { %v1765_v0 = vmov 0.0   ;;  %vm1766_vm0 = vmmov 0   ;;  %v1767_v6 = vmov 0   ;;  %vm46_vm1 = vcmask 261120   ;;  %s1768_s20 = smov 8   ;;  %s1769_s21 = smov 9   ;;  %s2386_s0 = inlined_call_operand.vmem [shape: f32[1,32,128], index: 0, kind: input, shape index: {}]   ;;  %s2387_s3 = inlined_call_operand.vmem [shape: f32[4,8,1], index: 3, kind: input, shape index: {}]   ;;  %s2388_s2 = inlined_call_operand.vmem [shape: bf16[4,8,32], index: 2, kind: input, shape index: {}]   ;;  %s2389_s8 = inlined_call_operand.vmem [shape: f32[4,32,1], index: 8, kind: input, shape index: {}]   ;;  %s2390_s7 = inlined_call_operand.vmem [shape: f32[4,32,1], index: 7, kind: input, shape index: {}]   ;;  %s2391_s6 = inlined_call_operand.vmem [shape: f32[4,2,32,1], index: 6, kind: input, shape index: {}]   ;;  %s2392_s5 = inlined_call_operand.vmem [shape: f32[4,2,1], index: 5, kind: input, shape index: {}]   ;;  %s2393_s1 = inlined_call_operand.vmem [shape: f32[9,1,128], index: 1, kind: input, shape index: {}]   ;;  %s2394_s4 = inlined_call_operand.vmem [shape: bf16[4,2,72], index: 4, kind: input, shape index: {}]   ;;  %s2395_s9 = inlined_call_operand.vmem [shape: f32[1,32,128], index: 9, kind: output, shape index: {}]  }
   0x1   :  { %1664 = vmatprep.subr.bf16.mxu1 %v1765_v0  ;;  %v1830_v1 = vld [vmem:[%s2386_s0] sm:$0xff]  ;;  %v1835_v2 = vld [vmem:[%s2386_s0 + $0x8] sm:$0xff]  ;;  %v1840_v3 = vld [vmem:[%s2386_s0 + $0x10] sm:$0xff]  ;;  %1668 = vmatprep.mubr.msk.bf16.mxu1 %vm1766_vm0, %v1765_v0  ;;  %s1770_s22 = smov 7   ;;  %s1771_s23 = smov 1   ;;  %vm214_vm3 = vcmask 1043456  }
   0x2   :  { %v38_v4 = vpack.c.bf16 %v1835_v2, %v1830_v1  ;;  %v1849_v5 = vld [vmem:[%s2386_s0 + $0x18] sm:$0xff]  ;;  %1763 = vset.pattern.permute.xlu0 %v1767_v6  ;;  %v40_v7 = vld [vmem:[%s2387_s3] sm:$0xff]  ;;  %1764 = vset.pattern.permute.xlu1 %v1767_v6  ;;  %s1772_s24 = smov 127   ;;  %s1773_s25 = smov 121   ;;  %v263_v21 = vld [vmem:[%s2389_s8 + $0x10] sm:$0xff]  ;;  %vm210_vm4 = vcmask 588800  }
   0x3   :  { %43 = vperm.xlu0 %1763, %v40_v7   ;;  %1686 = vmatprep.subr.bf16.mxu0 %v1765_v0  ;;  %v39_v8 = vpack.c.bf16 %v1849_v5, %v1840_v3  ;;  %v37_v9 = vld [vmem:[%s2388_s2] sm:$0xf]  ;;  %s1774_s26 = smov 120   ;;  %s1775_s27 = smov 119   ;;  %v291_v23 = vld [vmem:[%s2390_s7 + $0x10] sm:$0xff]  ;;  %v262_v27 = vld [vmem:[%s2389_s8 + $0x8] sm:$0xff] }
   0x4   :  { %1665 = vmatpush3.bf16.msra.mxu1 %v38_v4  ;;  %1690 = vmatprep.mubr.msk.bf16.mxu0 %vm1766_vm0, %v1765_v0  ;;  %v261_v18 = vld [vmem:[%s2389_s8] sm:$0xff]  ;;  %v319_v24 = vld [vmem:[%s2391_s6 + $0x10] sm:$0xff]  ;;  %v1518_v28 = vld [vmem:[%s2387_s3 + $0x8] sm:$0xff] }
   0x5   :  { %1666 = vmatprep.subr.bf16.mxu1 %v1765_v0  ;;  %v289_v19 = vld [vmem:[%s2390_s7] sm:$0xff]  ;;  %v1515_v26 = vld [vmem:[%s2391_s6 + $0x30] sm:$0xff]  ;;  %v290_v29 = vld [vmem:[%s2390_s7 + $0x8] sm:$0xff] }
   0x6   :  { %v317_v20 = vld [vmem:[%s2391_s6] sm:$0xff]  ;;  %v318_v30 = vld [vmem:[%s2391_s6 + $0x8] sm:$0xff]  ;;  %v264_v31 = vld [vmem:[%s2389_s8 + $0x18] sm:$0xff] }
   0x7   :  { %v1513_v22 = vld [vmem:[%s2391_s6 + $0x20] sm:$0xff]  ;;  %v1514_v32 = vld [vmem:[%s2391_s6 + $0x28] sm:$0xff]  ;;  %v292_v33 = vld [vmem:[%s2390_s7 + $0x18] sm:$0xff] }
   0x8   :  { %1667 = vmatpush3.bf16.msra.mxu1 %v39_v8  ;;  %v204_v25 = vld [vmem:[%s2392_s5] sm:$0x3]  ;;  %v320_v34 = vld [vmem:[%s2391_s6 + $0x18] sm:$0xff]  ;;  %v1954_v42 = vld [vmem:[%s2393_s1 + $0x2] ss:$0 sm:$0xff] }
   0x9   :  { %1672 = vmatprep.subr.bf16.mxu1 %v1765_v0  ;;  %v1516_v35 = vld [vmem:[%s2391_s6 + $0x38] sm:$0xff]  ;;  %v1942_v36 = vld [vmem:[%s2393_s1 + $0x1] ss:$0 sm:$0xff]  ;;  %v1947_v37 = vld [vmem:[%s2393_s1] ss:$0 sm:$0xff] }
   0xa   :  { %v1959_v43 = vld [vmem:[%s2393_s1 + $0x3] ss:$0 sm:$0xff]  ;;  %v1966_v49 = vld [vmem:[%s2393_s1 + $0x5] ss:$0 sm:$0xff]  ;;  %v1973_v54 = vld [vmem:[%s2393_s1 + $0x6] ss:$0 sm:$0xff] }
   0xb   :  { %1669 = vmatmul.mubr.msk.bf16.vlgmr.msra.gmra.mrb[0].mxu1 %vm46_vm1, %v37_v9  ;;  %v1978_v55 = vld [vmem:[%s2393_s1 + $0x7] ss:$0 sm:$0xff]  ;;  %v1984_v56 = vld [vmem:[%s2393_s1 + $0x8] ss:$0 sm:$0xff]  ;;  %v189_v7 = vld [vmem:[%s2394_s4] sm:$0x1] }
   0xc   :  { %1682 = vmatprep.mubr.msk.bf16.mxu1 %vm1766_vm0, %v1765_v0 }
  0x82   :  { %v44_v10 = vpop.permute.xlu0 %43 }
  0xde   :  { %v84_v11 = vpop.f32.mrb[0].mxu1 }
  0xdf   :  { %v85_v12 = vadd.f32 %v84_v11, %v44_v10  ;;  %v1670_v13 = vpop.f32.mrb[1].mxu1 }
  0xe0   :  { %v87_v14 = vpop.f32.mrb[2].mxu1 }
  0xe1   :  { %vm90_vm2 = vcmp.gt.f32.partialorder %v85_v12, 0.0  ;;  %v91_v15 = vmul.f32 0.01, %v85_v12  ;;  %v1671_v16 = vpop.f32.mrb[3].mxu1 }
  0xe3   :  { %v1867_v17 = vsel %vm90_vm2, %v85_v12, %v91_v15 }
  0xe4   :  { %104 = vrot.lane.b32.xlu1 %v1867_v17, %s1768_s20  ;;  %93 = vrot.lane.b32.xlu0 %v1867_v17, %s1769_s21 }
  0xe8   :  { %116 = vrot.lane.b32.xlu1 %v1867_v17, %s1770_s22  ;;  %128 = vrot.lane.b32.xlu0 %v1867_v17, %s1771_s23 }
  0xec   :  { %141 = vrot.lane.b32.xlu1 %v1867_v17, %s1772_s24  ;;  %153 = vrot.lane.b32.xlu0 %v1867_v17, %s1773_s25 }
  0xf0   :  { %165 = vrot.lane.b32.xlu1 %v1867_v17, %s1774_s26  ;;  %177 = vrot.lane.b32.xlu0 %v1867_v17, %s1775_s27 }
  0xf4   :  { %267 = vperm.xlu0 %1763, %v261_v18   ;;  %207 = vperm.xlu1 %1764, %v204_v25  }
  0xf8   :  { %295 = vperm.xlu0 %1763, %v289_v19   ;;  %272 = vperm.xlu1 %1764, %v262_v27   ;;  %v341_v19 = vlaneseq }
  0xfc   :  { %323 = vperm.xlu0 %1763, %v317_v20   ;;  %300 = vperm.xlu1 %1764, %v290_v29  }
 0x100   :  { %277 = vperm.xlu0 %1763, %v263_v21   ;;  %328 = vperm.xlu1 %1764, %v318_v30  }
 0x104   :  { %360 = vperm.xlu0 %1763, %v1513_v22   ;;  %282 = vperm.xlu1 %1764, %v264_v31   ;;  %v342_v22 = vshrl.u32 %v341_v19, 7 }
 0x106   :  { %v2002_v27 = vsub.s32 1, %v342_v22 }
 0x108   :  { %305 = vperm.xlu0 %1763, %v291_v23   ;;  %365 = vperm.xlu1 %1764, %v1514_v32  }
 0x10c   :  { %333 = vperm.xlu0 %1763, %v319_v24   ;;  %310 = vperm.xlu1 %1764, %v292_v33  }
 0x110   :  { %370 = vperm.xlu0 %1763, %v1515_v26   ;;  %338 = vperm.xlu1 %1764, %v320_v34   ;;  %v2000_v26 = vsub.s32 0, %v342_v22 }
 0x114   :  { %410 = vperm.xlu0 %1763, %v1518_v28   ;;  %375 = vperm.xlu1 %1764, %v1516_v35  }
 0x156   :  { %v105_v38 = vpop.permute.xlu1 %104  ;;  %v94_v39 = vpop.permute.xlu0 %93 }
 0x157   :  { %v114_v40 = vmul.f32 %v1942_v36, %v105_v38  ;;  %v102_v41 = vmul.f32 %v1947_v37, %v94_v39 }
 0x159   :  { %v199_v44 = vpack.c.bf16 %v114_v40, %v102_v41 }
 0x15a   :  { %v117_v45 = vpop.permute.xlu1 %116  ;;  %v129_v46 = vpop.permute.xlu0 %128 }
 0x15b   :  { %v126_v47 = vmul.f32 %v1954_v42, %v117_v45  ;;  %v138_v48 = vmul.f32 %v1959_v43, %v129_v46  ;;  %1673 = vmatpush3.bf16.msra.mxu1 %v199_v44 }
 0x15c   :  { %1674 = vmatprep.subr.bf16.mxu1 %v1765_v0 }
 0x15d   :  { %v200_v50 = vpack.c.bf16 %v138_v48, %v126_v47 }
 0x15e   :  { %v142_v51 = vpop.permute.xlu1 %141  ;;  %v154_v52 = vpop.permute.xlu0 %153 }
 0x15f   :  { %v151_v53 = vmul.f32 %v1966_v49, %v142_v51  ;;  %1675 = vmatpush3.bf16.msra.mxu1 %v200_v50  ;;  %v163_v60 = vmul.f32 %v1973_v54, %v154_v52 }
 0x160   :  { %1676 = vmatprep.subr.bf16.mxu1 %v1765_v0 }
 0x161   :  { %v201_v57 = vpack.c.bf16 %v151_v53, %v1867_v17 }
 0x162   :  { %v166_v58 = vpop.permute.xlu1 %165  ;;  %v178_v59 = vpop.permute.xlu0 %177 }
 0x163   :  { %v175_v61 = vmul.f32 %v1978_v55, %v166_v58  ;;  %v187_v62 = vmul.f32 %v1984_v56, %v178_v59  ;;  %1677 = vmatpush3.bf16.msra.mxu1 %v201_v57 }
 0x164   :  { %1678 = vmatprep.subr.bf16.mxu1 %v1765_v0 }
 0x165   :  { %v202_v63 = vpack.c.bf16 %v175_v61, %v163_v60  ;;  %v203_v4 = vpack.c.bf16 %v187_v62, %v187_v62 }
 0x167   :  { %1679 = vmatpush3.bf16.msra.mxu1 %v202_v63  ;;  %v216_v6 = vsel %vm214_vm3, %v203_v4, 0 }
 0x168   :  { %1680 = vmatprep.subr.bf16.mxu1 %v1765_v0 }
 0x16b   :  { %1681 = vmatpush3.bf16.msra.mxu1 %v216_v6 }
 0x16c   :  { %1708 = vmatprep.subr.bf16.mxu1 %v1765_v0 }
 0x16e   :  { %1683 = vmatmul.mubr.msk.bf16.vlgmr.msra.gmra.mrb[4].mxu1 %vm210_vm4, %v189_v7 }
 0x16f   :  { %1712 = vmatprep.mubr.msk.bf16.mxu1 %vm1766_vm0, %v1765_v0 }
 0x173   :  { %v208_v8 = vpop.permute.xlu1 %207  ;;  %v268_v9 = vpop.permute.xlu0 %267 }
 0x174   :  { %v285_v38 = vmul.f32 %v268_v9, %v1830_v1 }
 0x177   :  { %v273_v10 = vpop.permute.xlu1 %272  ;;  %v296_v11 = vpop.permute.xlu0 %295 }
 0x178   :  { %v286_v32 = vmul.f32 %v273_v10, %v1835_v2  ;;  %v313_v44 = vadd.f32 %v296_v11, %v285_v38  ;;  %v1550_v38 = vld [vmem:[%s2391_s6 + $0x60] sm:$0xff] }
 0x17b   :  { %v301_v12 = vpop.permute.xlu1 %300  ;;  %v324_v13 = vpop.permute.xlu0 %323 }
 0x17c   :  { %v314_v45 = vadd.f32 %v301_v12, %v286_v32  ;;  %v1546_v32 = vld [vmem:[%s2391_s6 + $0x40] sm:$0xff] }
 0x17f   :  { %v329_v14 = vpop.permute.xlu1 %328  ;;  %v278_v15 = vpop.permute.xlu0 %277 }
 0x180   :  { %v287_v41 = vmul.f32 %v278_v15, %v1840_v3 }
 0x183   :  { %v283_v16 = vpop.permute.xlu1 %282  ;;  %v361_v17 = vpop.permute.xlu0 %360 }
 0x184   :  { %v288_v34 = vmul.f32 %v283_v16, %v1849_v5 }
 0x187   :  { %v366_v18 = vpop.permute.xlu1 %365  ;;  %v306_v20 = vpop.permute.xlu0 %305 }
 0x188   :  { %v315_v48 = vadd.f32 %v306_v20, %v287_v41  ;;  %v1551_v41 = vld [vmem:[%s2391_s6 + $0x68] sm:$0xff] }
 0x18b   :  { %v311_v21 = vpop.permute.xlu1 %310  ;;  %v334_v31 = vpop.permute.xlu0 %333 }
 0x18c   :  { %v316_v50 = vadd.f32 %v311_v21, %v288_v34  ;;  %v1540_v34 = vld [vmem:[%s2389_s8 + $0x30] sm:$0xff] }
 0x18f   :  { %v339_v33 = vpop.permute.xlu1 %338  ;;  %v371_v52 = vpop.permute.xlu0 %370 }
 0x193   :  { %v376_v53 = vpop.permute.xlu1 %375 }
 0x241   :  { %v252_v23 = vpop.f32.mrb[4].mxu1 }
 0x242   :  { %v253_v24 = vadd.f32 %v252_v23, %v208_v8  ;;  %v1684_v25 = vpop.f32.mrb[5].mxu1 }
 0x243   :  { %v255_v28 = vpop.f32.mrb[6].mxu1 }
 0x244   :  { %vm258_vm5 = vcmp.gt.f32.partialorder %v253_v24, 0.0  ;;  %v259_v29 = vmul.f32 0.01, %v253_v24  ;;  %v1685_v30 = vpop.f32.mrb[7].mxu1  ;;  %v1538_v28 = vld [vmem:[%s2389_s8 + $0x20] sm:$0xff] }
 0x245   :  { %v1542_v30 = vld [vmem:[%s2390_s7 + $0x20] sm:$0xff] }
 0x246   :  { %v260_v35 = vsel %vm258_vm5, %v253_v24, %v259_v29  ;;  %v1536_v29 = vld [vmem:[%s2392_s5 + $0x2] sm:$0x3] }
 0x247   :  { %v344_v39 = vrot.slane %v260_v35, %v2000_v26  ;;  %v381_v40 = vrot.slane %v260_v35, %v2002_v27  ;;  %v1547_v35 = vld [vmem:[%s2391_s6 + $0x48] sm:$0xff] }
 0x249   :  { %v345_v46 = vmul.f32 %v344_v39, %v324_v13  ;;  %v346_v47 = vmul.f32 %v344_v39, %v329_v14  ;;  %v347_v51 = vmul.f32 %v344_v39, %v334_v31  ;;  %v348_v2 = vmul.f32 %v344_v39, %v339_v33  ;;  %v1539_v31 = vld [vmem:[%s2389_s8 + $0x28] sm:$0xff]  ;;  %v1541_v39 = vld [vmem:[%s2389_s8 + $0x38] sm:$0xff] }
 0x24a   :  { %v382_v58 = vmul.f32 %v381_v40, %v361_v17  ;;  %v383_v1 = vmul.f32 %v381_v40, %v366_v18  ;;  %v384_v61 = vmul.f32 %v381_v40, %v371_v52  ;;  %v385_v62 = vmul.f32 %v381_v40, %v376_v53  ;;  %v1517_v17 = vld [vmem:[%s2388_s2 + $0x4] sm:$0xf]  ;;  %v411_v18 = vpop.permute.xlu0 %410  ;;  %v1543_v33 = vld [vmem:[%s2390_s7 + $0x28] sm:$0xff]  ;;  %v1544_v40 = vld [vmem:[%s2390_s7 + $0x30] sm:$0xff] }
 0x24b   :  { %v349_v5 = vadd.f32 %v345_v46, %v313_v44  ;;  %v350_v57 = vadd.f32 %v346_v47, %v314_v45  ;;  %v351_v59 = vadd.f32 %v347_v51, %v315_v48  ;;  %v352_v60 = vadd.f32 %v348_v2, %v316_v50  ;;  %v1548_v44 = vld [vmem:[%s2391_s6 + $0x50] sm:$0xff]  ;;  %v1545_v45 = vld [vmem:[%s2390_s7 + $0x38] sm:$0xff] }
 0x24c   :  { %v1552_v46 = vld [vmem:[%s2391_s6 + $0x70] sm:$0xff]  ;;  %v1549_v47 = vld [vmem:[%s2391_s6 + $0x58] sm:$0xff] }
 0x24d   :  { %v386_v63 = vadd.f32 %v382_v58, %v349_v5  ;;  %v387_v3 = vadd.f32 %v383_v1, %v350_v57  ;;  %v388_v4 = vadd.f32 %v384_v61, %v351_v59  ;;  %v389_v6 = vadd.f32 %v385_v62, %v352_v60  ;;  %v1555_v48 = vld [vmem:[%s2387_s3 + $0x10] sm:$0xff]  ;;  %v1553_v50 = vld [vmem:[%s2391_s6 + $0x78] sm:$0xff] }
 0x24f   :  { %vm390_vm6 = vcmp.gt.f32.partialorder %v386_v63, 0.0  ;;  %vm391_vm7 = vcmp.gt.f32.partialorder %v387_v3, 0.0  ;;  %v394_v7 = vmul.f32 0.01, %v386_v63  ;;  %v395_v8 = vmul.f32 0.01, %v387_v3 }
 0x250   :  { %vm392_vm8 = vcmp.gt.f32.partialorder %v388_v4, 0.0  ;;  %vm393_vm9 = vcmp.gt.f32.partialorder %v389_v6, 0.0  ;;  %v396_v9 = vmul.f32 0.01, %v388_v4  ;;  %v397_v10 = vmul.f32 0.01, %v389_v6 }
 0x251   :  { %v2010_v11 = vsel %vm390_vm6, %v386_v63, %v394_v7  ;;  %v2012_v12 = vsel %vm391_vm7, %v387_v3, %v395_v8 }
 0x252   :  { %v404_v13 = vpack.c.bf16 %v2012_v12, %v2010_v11  ;;  %v2016_v14 = vsel %vm392_vm8, %v388_v4, %v396_v9  ;;  %v2018_v15 = vsel %vm393_vm9, %v389_v6, %v397_v10 }
 0x253   :  { %v405_v16 = vpack.c.bf16 %v2018_v15, %v2016_v14 }
 0x254   :  { %1687 = vmatpush3.bf16.msra.mxu0 %v404_v13 }
 0x255   :  { %1688 = vmatprep.subr.bf16.mxu0 %v1765_v0 }
 0x258   :  { %1689 = vmatpush3.bf16.msra.mxu0 %v405_v16 }
 0x259   :  { %1694 = vmatprep.subr.bf16.mxu0 %v1765_v0 }
 0x25b   :  { %1691 = vmatmul.mubr.msk.bf16.vlgmr.msra.gmra.mrb[0].mxu0 %vm46_vm1, %v1517_v17  ;;  %v1535_v17 = vld [vmem:[%s2394_s4 + $0x1] sm:$0x1] }
 0x25c   :  { %1704 = vmatprep.mubr.msk.bf16.mxu0 %vm1766_vm0, %v1765_v0 }
 0x32e   :  { %v450_v19 = vpop.f32.mrb[0].mxu0 }
 0x32f   :  { %v451_v20 = vadd.f32 %v450_v19, %v411_v18  ;;  %v1692_v21 = vpop.f32.mrb[1].mxu0 }
 0x330   :  { %v453_v22 = vpop.f32.mrb[2].mxu0 }
 0x331   :  { %vm456_vm10 = vcmp.gt.f32.partialorder %v451_v20, 0.0  ;;  %v457_v23 = vmul.f32 0.01, %v451_v20  ;;  %v1693_v24 = vpop.f32.mrb[3].mxu0 }
 0x333   :  { %v2030_v25 = vsel %vm456_vm10, %v451_v20, %v457_v23 }
 0x334   :  { %470 = vrot.lane.b32.xlu0 %v2030_v25, %s1768_s20  ;;  %459 = vrot.lane.b32.xlu1 %v2030_v25, %s1769_s21 }
 0x338   :  { %492 = vrot.lane.b32.xlu0 %v2030_v25, %s1771_s23  ;;  %481 = vrot.lane.b32.xlu1 %v2030_v25, %s1770_s22 }
 0x33c   :  { %515 = vrot.lane.b32.xlu0 %v2030_v25, %s1773_s25  ;;  %504 = vrot.lane.b32.xlu1 %v2030_v25, %s1772_s24 }
 0x340   :  { %537 = vrot.lane.b32.xlu0 %v2030_v25, %s1775_s27  ;;  %526 = vrot.lane.b32.xlu1 %v2030_v25, %s1774_s26 }
 0x344   :  { %627 = vperm.xlu0 %1763, %v1538_v28   ;;  %568 = vperm.xlu1 %1764, %v1536_v29  }
 0x348   :  { %656 = vperm.xlu0 %1763, %v1542_v30   ;;  %632 = vperm.xlu1 %1764, %v1539_v31  }
 0x34c   :  { %685 = vperm.xlu0 %1763, %v1546_v32   ;;  %661 = vperm.xlu1 %1764, %v1543_v33  }
 0x350   :  { %637 = vperm.xlu0 %1763, %v1540_v34   ;;  %690 = vperm.xlu1 %1764, %v1547_v35  }
 0x354   :  { %722 = vperm.xlu0 %1763, %v1550_v38   ;;  %642 = vperm.xlu1 %1764, %v1541_v39  }
 0x358   :  { %666 = vperm.xlu0 %1763, %v1544_v40   ;;  %727 = vperm.xlu1 %1764, %v1551_v41  }
 0x35c   :  { %695 = vperm.xlu0 %1763, %v1548_v44   ;;  %671 = vperm.xlu1 %1764, %v1545_v45  }
 0x360   :  { %732 = vperm.xlu0 %1763, %v1552_v46   ;;  %700 = vperm.xlu1 %1764, %v1549_v47  }
 0x364   :  { %772 = vperm.xlu0 %1763, %v1555_v48   ;;  %737 = vperm.xlu1 %1764, %v1553_v50  }
 0x3a6   :  { %v471_v51 = vpop.permute.xlu0 %470  ;;  %v460_v2 = vpop.permute.xlu1 %459 }
 0x3a7   :  { %v479_v52 = vmul.f32 %v1942_v36, %v471_v51  ;;  %v468_v53 = vmul.f32 %v1947_v37, %v460_v2 }
 0x3a9   :  { %v559_v5 = vpack.c.bf16 %v479_v52, %v468_v53 }
 0x3aa   :  { %v493_v57 = vpop.permute.xlu0 %492  ;;  %v482_v58 = vpop.permute.xlu1 %481 }
 0x3ab   :  { %v501_v1 = vmul.f32 %v1959_v43, %v493_v57  ;;  %v490_v59 = vmul.f32 %v1954_v42, %v482_v58  ;;  %1695 = vmatpush3.bf16.msra.mxu0 %v559_v5 }
 0x3ac   :  { %1696 = vmatprep.subr.bf16.mxu0 %v1765_v0 }
 0x3ad   :  { %v560_v60 = vpack.c.bf16 %v501_v1, %v490_v59 }
 0x3ae   :  { %v516_v61 = vpop.permute.xlu0 %515  ;;  %v505_v62 = vpop.permute.xlu1 %504 }
 0x3af   :  { %v513_v63 = vmul.f32 %v1966_v49, %v505_v62  ;;  %1697 = vmatpush3.bf16.msra.mxu0 %v560_v60  ;;  %v524_v7 = vmul.f32 %v1973_v54, %v516_v61 }
 0x3b0   :  { %1698 = vmatprep.subr.bf16.mxu0 %v1765_v0 }
 0x3b1   :  { %v561_v3 = vpack.c.bf16 %v513_v63, %v2030_v25 }
 0x3b2   :  { %v538_v4 = vpop.permute.xlu0 %537  ;;  %v527_v6 = vpop.permute.xlu1 %526 }
 0x3b3   :  { %v546_v8 = vmul.f32 %v1984_v56, %v538_v4  ;;  %v535_v9 = vmul.f32 %v1978_v55, %v527_v6  ;;  %1699 = vmatpush3.bf16.msra.mxu0 %v561_v3 }
 0x3b4   :  { %1700 = vmatprep.subr.bf16.mxu0 %v1765_v0 }
 0x3b5   :  { %v562_v10 = vpack.c.bf16 %v535_v9, %v524_v7  ;;  %v563_v13 = vpack.c.bf16 %v546_v8, %v546_v8 }
 0x3b7   :  { %1701 = vmatpush3.bf16.msra.mxu0 %v562_v10  ;;  %v575_v16 = vsel %vm214_vm3, %v563_v13, 0 }
 0x3b8   :  { %1702 = vmatprep.subr.bf16.mxu0 %v1765_v0 }
 0x3bb   :  { %1703 = vmatpush3.bf16.msra.mxu0 %v575_v16 }
 0x3bc   :  { %1730 = vmatprep.subr.bf16.mxu0 %v1765_v0 }
 0x3be   :  { %1705 = vmatmul.mubr.msk.bf16.vlgmr.msra.gmra.mrb[4].mxu0 %vm210_vm4, %v1535_v17 }
 0x3bf   :  { %1734 = vmatprep.mubr.msk.bf16.mxu0 %vm1766_vm0, %v1765_v0 }
 0x3c3   :  { %v569_v18 = vpop.permute.xlu1 %568  ;;  %v628_v19 = vpop.permute.xlu0 %627 }
 0x3c4   :  { %v645_v45 = vmul.f32 %v628_v19, %v2010_v11 }
 0x3c7   :  { %v633_v20 = vpop.permute.xlu1 %632  ;;  %v657_v21 = vpop.permute.xlu0 %656 }
 0x3c8   :  { %v646_v46 = vmul.f32 %v633_v20, %v2012_v12  ;;  %v674_v52 = vadd.f32 %v657_v21, %v645_v45  ;;  %v1580_v45 = vld [vmem:[%s2390_s7 + $0x48] sm:$0xff] }
 0x3cb   :  { %v662_v22 = vpop.permute.xlu1 %661  ;;  %v686_v23 = vpop.permute.xlu0 %685 }
 0x3cc   :  { %v675_v53 = vadd.f32 %v662_v22, %v646_v46  ;;  %v1577_v46 = vld [vmem:[%s2389_s8 + $0x50] sm:$0xff] }
 0x3cf   :  { %v691_v24 = vpop.permute.xlu1 %690  ;;  %v638_v25 = vpop.permute.xlu0 %637 }
 0x3d0   :  { %v647_v47 = vmul.f32 %v638_v25, %v2016_v14  ;;  %v1554_v25 = vld [vmem:[%s2388_s2 + $0x8] sm:$0xf] }
 0x3d3   :  { %v643_v28 = vpop.permute.xlu1 %642  ;;  %v723_v29 = vpop.permute.xlu0 %722 }
 0x3d4   :  { %v648_v48 = vmul.f32 %v643_v28, %v2018_v15 }
 0x3d7   :  { %v728_v30 = vpop.permute.xlu1 %727  ;;  %v667_v31 = vpop.permute.xlu0 %666 }
 0x3d8   :  { %v676_v5 = vadd.f32 %v667_v31, %v647_v47  ;;  %v1584_v47 = vld [vmem:[%s2391_s6 + $0x88] sm:$0xff] }
 0x3db   :  { %v672_v32 = vpop.permute.xlu1 %671  ;;  %v696_v34 = vpop.permute.xlu0 %695 }
 0x3dc   :  { %v677_v57 = vadd.f32 %v672_v32, %v648_v48  ;;  %v1587_v48 = vld [vmem:[%s2391_s6 + $0xa0] sm:$0xff] }
 0x3df   :  { %v701_v39 = vpop.permute.xlu1 %700  ;;  %v733_v58 = vpop.permute.xlu0 %732 }
 0x3e3   :  { %v738_v1 = vpop.permute.xlu1 %737  ;;  %v773_v28 = vpop.permute.xlu0 %772 }
 0x491   :  { %v611_v33 = vpop.f32.mrb[4].mxu0 }
 0x492   :  { %v612_v35 = vadd.f32 %v611_v33, %v569_v18  ;;  %v1706_v38 = vpop.f32.mrb[5].mxu0 }
 0x493   :  { %v614_v40 = vpop.f32.mrb[6].mxu0  ;;  %v1575_v38 = vld [vmem:[%s2389_s8 + $0x40] sm:$0xff] }
 0x494   :  { %vm617_vm11 = vcmp.gt.f32.partialorder %v612_v35, 0.0  ;;  %v618_v41 = vmul.f32 0.01, %v612_v35  ;;  %v1707_v44 = vpop.f32.mrb[7].mxu0  ;;  %v1579_v40 = vld [vmem:[%s2390_s7 + $0x40] sm:$0xff] }
 0x495   :  { %v1583_v44 = vld [vmem:[%s2391_s6 + $0x80] sm:$0xff] }
 0x496   :  { %v619_v50 = vsel %vm617_vm11, %v612_v35, %v618_v41  ;;  %v1576_v41 = vld [vmem:[%s2389_s8 + $0x48] sm:$0xff] }
 0x497   :  { %v706_v51 = vrot.slane %v619_v50, %v2000_v26  ;;  %v743_v2 = vrot.slane %v619_v50, %v2002_v27  ;;  %v1578_v50 = vld [vmem:[%s2389_s8 + $0x58] sm:$0xff] }
 0x499   :  { %v707_v59 = vmul.f32 %v706_v51, %v686_v23  ;;  %v708_v60 = vmul.f32 %v706_v51, %v691_v24  ;;  %v709_v11 = vmul.f32 %v706_v51, %v696_v34  ;;  %v710_v61 = vmul.f32 %v706_v51, %v701_v39  ;;  %v1573_v39 = vld [vmem:[%s2392_s5 + $0x4] sm:$0x3]  ;;  %v1581_v51 = vld [vmem:[%s2390_s7 + $0x50] sm:$0xff] }
 0x49a   :  { %v744_v12 = vmul.f32 %v743_v2, %v723_v29  ;;  %v745_v62 = vmul.f32 %v743_v2, %v728_v30  ;;  %v746_v14 = vmul.f32 %v743_v2, %v733_v58  ;;  %v747_v63 = vmul.f32 %v743_v2, %v738_v1  ;;  %v1588_v2 = vld [vmem:[%s2391_s6 + $0xa8] sm:$0xff]  ;;  %v1592_v58 = vld [vmem:[%s2387_s3 + $0x18] sm:$0xff] }
 0x49b   :  { %v711_v15 = vadd.f32 %v707_v59, %v674_v52  ;;  %v712_v3 = vadd.f32 %v708_v60, %v675_v53  ;;  %v713_v4 = vadd.f32 %v709_v11, %v676_v5  ;;  %v714_v6 = vadd.f32 %v710_v61, %v677_v57  ;;  %v1585_v52 = vld [vmem:[%s2391_s6 + $0x90] sm:$0xff]  ;;  %v1582_v53 = vld [vmem:[%s2390_s7 + $0x58] sm:$0xff] }
 0x49c   :  { %v1589_v5 = vld [vmem:[%s2391_s6 + $0xb0] sm:$0xff]  ;;  %v1586_v57 = vld [vmem:[%s2391_s6 + $0x98] sm:$0xff] }
 0x49d   :  { %v748_v7 = vadd.f32 %v744_v12, %v711_v15  ;;  %v749_v8 = vadd.f32 %v745_v62, %v712_v3  ;;  %v750_v9 = vadd.f32 %v746_v14, %v713_v4  ;;  %v751_v10 = vadd.f32 %v747_v63, %v714_v6  ;;  %v1590_v1 = vld [vmem:[%s2391_s6 + $0xb8] sm:$0xff] }
 0x49f   :  { %vm752_vm12 = vcmp.gt.f32.partialorder %v748_v7, 0.0  ;;  %vm753_vm13 = vcmp.gt.f32.partialorder %v749_v8, 0.0  ;;  %v756_v13 = vmul.f32 0.01, %v748_v7  ;;  %v757_v16 = vmul.f32 0.01, %v749_v8 }
 0x4a0   :  { %vm754_vm14 = vcmp.gt.f32.partialorder %v750_v9, 0.0  ;;  %vm755_vm15 = vcmp.gt.f32.partialorder %v751_v10, 0.0  ;;  %v758_v17 = vmul.f32 0.01, %v750_v9  ;;  %v759_v18 = vmul.f32 0.01, %v751_v10 }
 0x4a1   :  { %v2129_v19 = vsel %vm752_vm12, %v748_v7, %v756_v13  ;;  %v2131_v20 = vsel %vm753_vm13, %v749_v8, %v757_v16  ;;  %v1572_v16 = vld [vmem:[%s2394_s4 + $0x2] sm:$0x1] }
 0x4a2   :  { %v766_v21 = vpack.c.bf16 %v2131_v20, %v2129_v19  ;;  %v2135_v22 = vsel %vm754_vm14, %v750_v9, %v758_v17  ;;  %v2137_v23 = vsel %vm755_vm15, %v751_v10, %v759_v18 }
 0x4a3   :  { %v767_v24 = vpack.c.bf16 %v2137_v23, %v2135_v22 }
 0x4a4   :  { %1709 = vmatpush3.bf16.msra.mxu1 %v766_v21 }
 0x4a5   :  { %1710 = vmatprep.subr.bf16.mxu1 %v1765_v0 }
 0x4a8   :  { %1711 = vmatpush3.bf16.msra.mxu1 %v767_v24 }
 0x4a9   :  { %1716 = vmatprep.subr.bf16.mxu1 %v1765_v0 }
 0x4ab   :  { %1713 = vmatmul.mubr.msk.bf16.vlgmr.msra.gmra.mrb[8].mxu1 %vm46_vm1, %v1554_v25 }
 0x4ac   :  { %1726 = vmatprep.mubr.msk.bf16.mxu1 %vm1766_vm0, %v1765_v0 }
 0x57e   :  { %v812_v29 = vpop.f32.mrb[8].mxu1 }
 0x57f   :  { %v813_v30 = vadd.f32 %v812_v29, %v773_v28  ;;  %v1714_v31 = vpop.f32.mrb[9].mxu1 }
 0x580   :  { %v815_v32 = vpop.f32.mrb[10].mxu1 }
 0x581   :  { %vm818_vm2 = vcmp.gt.f32.partialorder %v813_v30, 0.0  ;;  %v819_v33 = vmul.f32 0.01, %v813_v30  ;;  %v1715_v34 = vpop.f32.mrb[11].mxu1 }
 0x583   :  { %v2149_v35 = vsel %vm818_vm2, %v813_v30, %v819_v33 }
 0x584   :  { %832 = vrot.lane.b32.xlu0 %v2149_v35, %s1768_s20  ;;  %821 = vrot.lane.b32.xlu1 %v2149_v35, %s1769_s21 }
 0x588   :  { %854 = vrot.lane.b32.xlu0 %v2149_v35, %s1771_s23  ;;  %843 = vrot.lane.b32.xlu1 %v2149_v35, %s1770_s22 }
 0x58c   :  { %877 = vrot.lane.b32.xlu0 %v2149_v35, %s1773_s25  ;;  %866 = vrot.lane.b32.xlu1 %v2149_v35, %s1772_s24 }
 0x590   :  { %899 = vrot.lane.b32.xlu0 %v2149_v35, %s1775_s27  ;;  %888 = vrot.lane.b32.xlu1 %v2149_v35, %s1774_s26 }
 0x594   :  { %989 = vperm.xlu0 %1763, %v1575_v38   ;;  %930 = vperm.xlu1 %1764, %v1573_v39  }
 0x598   :  { %1018 = vperm.xlu0 %1763, %v1579_v40   ;;  %994 = vperm.xlu1 %1764, %v1576_v41  }
 0x59c   :  { %1047 = vperm.xlu0 %1763, %v1583_v44   ;;  %1023 = vperm.xlu1 %1764, %v1580_v45  }
 0x5a0   :  { %999 = vperm.xlu0 %1763, %v1577_v46   ;;  %1052 = vperm.xlu1 %1764, %v1584_v47  }
 0x5a4   :  { %1084 = vperm.xlu0 %1763, %v1587_v48   ;;  %1004 = vperm.xlu1 %1764, %v1578_v50  }
 0x5a8   :  { %1028 = vperm.xlu0 %1763, %v1581_v51   ;;  %1089 = vperm.xlu1 %1764, %v1588_v2  }
 0x5ac   :  { %1057 = vperm.xlu0 %1763, %v1585_v52   ;;  %1033 = vperm.xlu1 %1764, %v1582_v53  }
 0x5b0   :  { %1094 = vperm.xlu0 %1763, %v1589_v5   ;;  %1062 = vperm.xlu1 %1764, %v1586_v57  }
 0x5b4   :  { %1134 = vperm.xlu0 %1763, %v1592_v58   ;;  %1099 = vperm.xlu1 %1764, %v1590_v1  }
 0x5f6   :  { %v833_v59 = vpop.permute.xlu0 %832  ;;  %v822_v60 = vpop.permute.xlu1 %821 }
 0x5f7   :  { %v841_v11 = vmul.f32 %v1942_v36, %v833_v59  ;;  %v830_v61 = vmul.f32 %v1947_v37, %v822_v60 }
 0x5f9   :  { %v921_v12 = vpack.c.bf16 %v841_v11, %v830_v61 }
 0x5fa   :  { %v855_v62 = vpop.permute.xlu0 %854  ;;  %v844_v14 = vpop.permute.xlu1 %843 }
 0x5fb   :  { %v863_v63 = vmul.f32 %v1959_v43, %v855_v62  ;;  %v852_v15 = vmul.f32 %v1954_v42, %v844_v14  ;;  %1717 = vmatpush3.bf16.msra.mxu1 %v921_v12 }
 0x5fc   :  { %1718 = vmatprep.subr.bf16.mxu1 %v1765_v0 }
 0x5fd   :  { %v922_v3 = vpack.c.bf16 %v863_v63, %v852_v15 }
 0x5fe   :  { %v878_v4 = vpop.permute.xlu0 %877  ;;  %v867_v6 = vpop.permute.xlu1 %866 }
 0x5ff   :  { %v875_v7 = vmul.f32 %v1966_v49, %v867_v6  ;;  %1719 = vmatpush3.bf16.msra.mxu1 %v922_v3  ;;  %v886_v9 = vmul.f32 %v1973_v54, %v878_v4 }
 0x600   :  { %1720 = vmatprep.subr.bf16.mxu1 %v1765_v0 }
 0x601   :  { %v923_v36 = vpack.c.bf16 %v875_v7, %v2149_v35 }
 0x602   :  { %v900_v37 = vpop.permute.xlu0 %899  ;;  %v889_v8 = vpop.permute.xlu1 %888 }
 0x603   :  { %v908_v43 = vmul.f32 %v1984_v56, %v900_v37  ;;  %v897_v42 = vmul.f32 %v1978_v55, %v889_v8  ;;  %1721 = vmatpush3.bf16.msra.mxu1 %v923_v36 }
 0x604   :  { %1722 = vmatprep.subr.bf16.mxu1 %v1765_v0 }
 0x605   :  { %v924_v10 = vpack.c.bf16 %v897_v42, %v886_v9  ;;  %v925_v13 = vpack.c.bf16 %v908_v43, %v908_v43 }
 0x607   :  { %1723 = vmatpush3.bf16.msra.mxu1 %v924_v10  ;;  %v937_v49 = vsel %vm214_vm3, %v925_v13, 0 }
 0x608   :  { %1724 = vmatprep.subr.bf16.mxu1 %v1765_v0 }
 0x60b   :  { %1725 = vmatpush3.bf16.msra.mxu1 %v937_v49 }
 0x60e   :  { %1727 = vmatmul.mubr.msk.bf16.vlgmr.msra.gmra.mrb[12].mxu1 %vm210_vm4, %v1572_v16  ;;  %v1591_v16 = vld [vmem:[%s2388_s2 + $0xc] sm:$0xf] }
 0x613   :  { %v931_v54 = vpop.permute.xlu1 %930  ;;  %v990_v56 = vpop.permute.xlu0 %989 }
 0x614   :  { %v1007_v45 = vmul.f32 %v990_v56, %v2129_v19 }
 0x617   :  { %v995_v55 = vpop.permute.xlu1 %994  ;;  %v1019_v17 = vpop.permute.xlu0 %1018 }
 0x618   :  { %v1008_v46 = vmul.f32 %v995_v55, %v2131_v20  ;;  %v1036_v52 = vadd.f32 %v1019_v17, %v1007_v45  ;;  %v1623_v45 = vld [vmem:[%s2391_s6 + $0xd8] sm:$0xff] }
 0x61b   :  { %v1024_v18 = vpop.permute.xlu1 %1023  ;;  %v1048_v21 = vpop.permute.xlu0 %1047 }
 0x61c   :  { %v1037_v53 = vadd.f32 %v1024_v18, %v1008_v46  ;;  %v1626_v46 = vld [vmem:[%s2391_s6 + $0xf0] sm:$0xff] }
 0x61f   :  { %v1053_v24 = vpop.permute.xlu1 %1052  ;;  %v1000_v25 = vpop.permute.xlu0 %999 }
 0x620   :  { %v1009_v47 = vmul.f32 %v1000_v25, %v2135_v22 }
 0x623   :  { %v1005_v28 = vpop.permute.xlu1 %1004  ;;  %v1085_v29 = vpop.permute.xlu0 %1084 }
 0x624   :  { %v1010_v48 = vmul.f32 %v1005_v28, %v2137_v23  ;;  %v1612_v28 = vld [vmem:[%s2389_s8 + $0x60] sm:$0xff] }
 0x627   :  { %v1090_v30 = vpop.permute.xlu1 %1089  ;;  %v1029_v31 = vpop.permute.xlu0 %1028 }
 0x628   :  { %v1038_v5 = vadd.f32 %v1029_v31, %v1009_v47  ;;  %v1613_v31 = vld [vmem:[%s2389_s8 + $0x68] sm:$0xff] }
 0x629   :  { %v1625_v47 = vld [vmem:[%s2391_s6 + $0xe8] sm:$0xff] }
 0x62b   :  { %v1034_v32 = vpop.permute.xlu1 %1033  ;;  %v1058_v34 = vpop.permute.xlu0 %1057 }
 0x62c   :  { %v1039_v57 = vadd.f32 %v1034_v32, %v1010_v48  ;;  %v1616_v32 = vld [vmem:[%s2390_s7 + $0x60] sm:$0xff]  ;;  %v1627_v48 = vld [vmem:[%s2391_s6 + $0xf8] sm:$0xff] }
 0x62f   :  { %v1063_v39 = vpop.permute.xlu1 %1062  ;;  %v1095_v58 = vpop.permute.xlu0 %1094 }
 0x633   :  { %v1100_v1 = vpop.permute.xlu1 %1099 }
 0x6e1   :  { %v973_v33 = vpop.f32.mrb[12].mxu1 }
 0x6e2   :  { %v974_v35 = vadd.f32 %v973_v33, %v931_v54  ;;  %v1728_v38 = vpop.f32.mrb[13].mxu1  ;;  %v1135_v54 = vpop.permute.xlu0 %1134  ;;  %v1615_v33 = vld [vmem:[%s2389_s8 + $0x78] sm:$0xff] }
 0x6e3   :  { %v976_v40 = vpop.f32.mrb[14].mxu1  ;;  %v1620_v38 = vld [vmem:[%s2391_s6 + $0xc0] sm:$0xff] }
 0x6e4   :  { %vm979_vm5 = vcmp.gt.f32.partialorder %v974_v35, 0.0  ;;  %v980_v41 = vmul.f32 0.01, %v974_v35  ;;  %v1729_v44 = vpop.f32.mrb[15].mxu1  ;;  %v1622_v40 = vld [vmem:[%s2391_s6 + $0xd0] sm:$0xff] }
 0x6e5   :  { %v1624_v44 = vld [vmem:[%s2391_s6 + $0xe0] sm:$0xff] }
 0x6e6   :  { %v981_v50 = vsel %vm979_vm5, %v974_v35, %v980_v41  ;;  %v1617_v35 = vld [vmem:[%s2390_s7 + $0x68] sm:$0xff] }
 0x6e7   :  { %v1068_v51 = vrot.slane %v981_v50, %v2000_v26  ;;  %v1105_v2 = vrot.slane %v981_v50, %v2002_v27  ;;  %v1621_v41 = vld [vmem:[%s2391_s6 + $0xc8] sm:$0xff]  ;;  %v1596_v50 = vld [vmem:[%s2393_s1 + $0x1] ss:$0 sm:$0xff] }
 0x6e9   :  { %v1069_v59 = vmul.f32 %v1068_v51, %v1048_v21  ;;  %v1070_v60 = vmul.f32 %v1068_v51, %v1053_v24  ;;  %v1071_v19 = vmul.f32 %v1068_v51, %v1058_v34  ;;  %v1072_v11 = vmul.f32 %v1068_v51, %v1063_v39  ;;  %v1618_v34 = vld [vmem:[%s2390_s7 + $0x70] sm:$0xff]  ;;  %v1619_v39 = vld [vmem:[%s2390_s7 + $0x78] sm:$0xff]  ;;  %v1594_v51 = vld [vmem:[%s2393_s1] ss:$0 sm:$0xff] }
 0x6ea   :  { %v1106_v20 = vmul.f32 %v1105_v2, %v1085_v29  ;;  %v1107_v61 = vmul.f32 %v1105_v2, %v1090_v30  ;;  %v1108_v22 = vmul.f32 %v1105_v2, %v1095_v58  ;;  %v1109_v12 = vmul.f32 %v1105_v2, %v1100_v1  ;;  %v1610_v29 = vld [vmem:[%s2392_s5 + $0x6] sm:$0x3]  ;;  %v1614_v30 = vld [vmem:[%s2389_s8 + $0x70] sm:$0xff]  ;;  %v1598_v58 = vld [vmem:[%s2393_s1 + $0x2] ss:$0 sm:$0xff] }
 0x6eb   :  { %v1073_v23 = vadd.f32 %v1069_v59, %v1036_v52  ;;  %v1074_v62 = vadd.f32 %v1070_v60, %v1037_v53  ;;  %v1075_v14 = vadd.f32 %v1071_v19, %v1038_v5  ;;  %v1076_v63 = vadd.f32 %v1072_v11, %v1039_v57  ;;  %v1600_v57 = vld [vmem:[%s2393_s1 + $0x3] ss:$0 sm:$0xff] }
 0x6ed   :  { %v1110_v15 = vadd.f32 %v1106_v20, %v1073_v23  ;;  %v1111_v3 = vadd.f32 %v1107_v61, %v1074_v62  ;;  %v1112_v4 = vadd.f32 %v1108_v22, %v1075_v14  ;;  %v1113_v6 = vadd.f32 %v1109_v12, %v1076_v63  ;;  %v1602_v20 = vld [vmem:[%s2393_s1 + $0x5] ss:$0 sm:$0xff]  ;;  %v1604_v62 = vld [vmem:[%s2393_s1 + $0x6] ss:$0 sm:$0xff]  ;;  %v1608_v14 = vld [vmem:[%s2393_s1 + $0x8] ss:$0 sm:$0xff] }
 0x6ee   :  { %v1606_v63 = vld [vmem:[%s2393_s1 + $0x7] ss:$0 sm:$0xff] }
 0x6ef   :  { %vm1114_vm6 = vcmp.gt.f32.partialorder %v1110_v15, 0.0  ;;  %vm1115_vm7 = vcmp.gt.f32.partialorder %v1111_v3, 0.0  ;;  %v1118_v7 = vmul.f32 0.01, %v1110_v15  ;;  %v1119_v36 = vmul.f32 0.01, %v1111_v3 }
 0x6f0   :  { %vm1116_vm8 = vcmp.gt.f32.partialorder %v1112_v4, 0.0  ;;  %vm1117_vm9 = vcmp.gt.f32.partialorder %v1113_v6, 0.0  ;;  %v1120_v37 = vmul.f32 0.01, %v1112_v4  ;;  %v1121_v8 = vmul.f32 0.01, %v1113_v6 }
 0x6f1   :  { %v2245_v9 = vsel %vm1114_vm6, %v1110_v15, %v1118_v7  ;;  %v2247_v43 = vsel %vm1115_vm7, %v1111_v3, %v1119_v36 }
 0x6f2   :  { %v1128_v42 = vpack.c.bf16 %v2247_v43, %v2245_v9  ;;  %v2251_v10 = vsel %vm1116_vm8, %v1112_v4, %v1120_v37  ;;  %v2253_v13 = vsel %vm1117_vm9, %v1113_v6, %v1121_v8 }
 0x6f3   :  { %v1129_v49 = vpack.c.bf16 %v2253_v13, %v2251_v10 }
 0x6f4   :  { %1731 = vmatpush3.bf16.msra.mxu0 %v1128_v42 }
 0x6f5   :  { %1732 = vmatprep.subr.bf16.mxu0 %v1765_v0 }
 0x6f8   :  { %1733 = vmatpush3.bf16.msra.mxu0 %v1129_v49  ;;  %v1609_v49 = vld [vmem:[%s2394_s4 + $0x3] sm:$0x1] }
 0x6f9   :  { %1738 = vmatprep.subr.bf16.mxu0 %v1765_v0 }
 0x6fb   :  { %1735 = vmatmul.mubr.msk.bf16.vlgmr.msra.gmra.mrb[8].mxu0 %vm46_vm1, %v1591_v16 }
 0x6fc   :  { %1748 = vmatprep.mubr.msk.bf16.mxu0 %vm1766_vm0, %v1765_v0 }
 0x7ce   :  { %v1174_v56 = vpop.f32.mrb[8].mxu0 }
 0x7cf   :  { %v1175_v55 = vadd.f32 %v1174_v56, %v1135_v54  ;;  %v1736_v17 = vpop.f32.mrb[9].mxu0 }
 0x7d0   :  { %v1177_v18 = vpop.f32.mrb[10].mxu0 }
 0x7d1   :  { %vm1180_vm10 = vcmp.gt.f32.partialorder %v1175_v55, 0.0  ;;  %v1181_v21 = vmul.f32 0.01, %v1175_v55  ;;  %v1737_v24 = vpop.f32.mrb[11].mxu0 }
 0x7d3   :  { %v2265_v25 = vsel %vm1180_vm10, %v1175_v55, %v1181_v21 }
 0x7d4   :  { %1194 = vrot.lane.b32.xlu0 %v2265_v25, %s1768_s20  ;;  %1183 = vrot.lane.b32.xlu1 %v2265_v25, %s1769_s21 }
 0x7d8   :  { %1216 = vrot.lane.b32.xlu0 %v2265_v25, %s1771_s23  ;;  %1205 = vrot.lane.b32.xlu1 %v2265_v25, %s1770_s22 }
 0x7dc   :  { %1239 = vrot.lane.b32.xlu0 %v2265_v25, %s1773_s25  ;;  %1228 = vrot.lane.b32.xlu1 %v2265_v25, %s1772_s24 }
 0x7e0   :  { %1261 = vrot.lane.b32.xlu0 %v2265_v25, %s1775_s27  ;;  %1250 = vrot.lane.b32.xlu1 %v2265_v25, %s1774_s26 }
 0x7e4   :  { %1351 = vperm.xlu0 %1763, %v1612_v28   ;;  %1292 = vperm.xlu1 %1764, %v1610_v29  }
 0x7e8   :  { %1361 = vperm.xlu0 %1763, %v1614_v30   ;;  %1356 = vperm.xlu1 %1764, %v1613_v31  }
 0x7ec   :  { %1380 = vperm.xlu0 %1763, %v1616_v32   ;;  %1366 = vperm.xlu1 %1764, %v1615_v33  }
 0x7f0   :  { %1390 = vperm.xlu0 %1763, %v1618_v34   ;;  %1385 = vperm.xlu1 %1764, %v1617_v35  }
 0x7f4   :  { %1409 = vperm.xlu0 %1763, %v1620_v38   ;;  %1395 = vperm.xlu1 %1764, %v1619_v39  }
 0x7f8   :  { %1419 = vperm.xlu0 %1763, %v1622_v40   ;;  %1414 = vperm.xlu1 %1764, %v1621_v41  }
 0x7fc   :  { %1446 = vperm.xlu0 %1763, %v1624_v44   ;;  %1424 = vperm.xlu1 %1764, %v1623_v45  }
 0x800   :  { %1456 = vperm.xlu0 %1763, %v1626_v46   ;;  %1451 = vperm.xlu1 %1764, %v1625_v47  }
 0x804   :  { %1461 = vperm.xlu1 %1764, %v1627_v48  }
 0x846   :  { %v1195_v2 = vpop.permute.xlu0 %1194  ;;  %v1184_v52 = vpop.permute.xlu1 %1183 }
 0x847   :  { %v1203_v53 = vmul.f32 %v1596_v50, %v1195_v2  ;;  %v1192_v5 = vmul.f32 %v1594_v51, %v1184_v52 }
 0x849   :  { %v1283_v1 = vpack.c.bf16 %v1203_v53, %v1192_v5 }
 0x84a   :  { %v1217_v59 = vpop.permute.xlu0 %1216  ;;  %v1206_v60 = vpop.permute.xlu1 %1205 }
 0x84b   :  { %v1225_v19 = vmul.f32 %v1600_v57, %v1217_v59  ;;  %v1214_v11 = vmul.f32 %v1598_v58, %v1206_v60  ;;  %1739 = vmatpush3.bf16.msra.mxu0 %v1283_v1 }
 0x84c   :  { %1740 = vmatprep.subr.bf16.mxu0 %v1765_v0 }
 0x84d   :  { %v1284_v61 = vpack.c.bf16 %v1225_v19, %v1214_v11 }
 0x84e   :  { %v1240_v22 = vpop.permute.xlu0 %1239  ;;  %v1229_v12 = vpop.permute.xlu1 %1228 }
 0x84f   :  { %v1237_v23 = vmul.f32 %v1602_v20, %v1229_v12  ;;  %1741 = vmatpush3.bf16.msra.mxu0 %v1284_v61  ;;  %v1248_v6 = vmul.f32 %v1604_v62, %v1240_v22 }
 0x850   :  { %1742 = vmatprep.subr.bf16.mxu0 %v1765_v0 }
 0x851   :  { %v1285_v15 = vpack.c.bf16 %v1237_v23, %v2265_v25 }
 0x852   :  { %v1262_v3 = vpop.permute.xlu0 %1261  ;;  %v1251_v4 = vpop.permute.xlu1 %1250 }
 0x853   :  { %v1270_v7 = vmul.f32 %v1608_v14, %v1262_v3  ;;  %v1259_v36 = vmul.f32 %v1606_v63, %v1251_v4  ;;  %1743 = vmatpush3.bf16.msra.mxu0 %v1285_v15 }
 0x854   :  { %1744 = vmatprep.subr.bf16.mxu0 %v1765_v0 }
 0x855   :  { %v1286_v37 = vpack.c.bf16 %v1259_v36, %v1248_v6  ;;  %v1287_v8 = vpack.c.bf16 %v1270_v7, %v1270_v7 }
 0x857   :  { %1745 = vmatpush3.bf16.msra.mxu0 %v1286_v37  ;;  %v1299_v42 = vsel %vm214_vm3, %v1287_v8, 0 }
 0x858   :  { %1746 = vmatprep.subr.bf16.mxu0 %v1765_v0 }
 0x85b   :  { %1747 = vmatpush3.bf16.msra.mxu0 %v1299_v42 }
 0x85e   :  { %1749 = vmatmul.mubr.msk.bf16.vlgmr.msra.gmra.mrb[12].mxu0 %vm210_vm4, %v1609_v49 }
 0x863   :  { %v1293_v16 = vpop.permute.xlu1 %1292  ;;  %v1352_v54 = vpop.permute.xlu0 %1351 }
 0x864   :  { %v1369_v41 = vmul.f32 %v1352_v54, %v2245_v9 }
 0x867   :  { %v1357_v56 = vpop.permute.xlu1 %1356  ;;  %v1362_v55 = vpop.permute.xlu0 %1361 }
 0x868   :  { %v1371_v44 = vmul.f32 %v1362_v55, %v2251_v10  ;;  %v1370_v45 = vmul.f32 %v1357_v56, %v2247_v43 }
 0x86b   :  { %v1367_v17 = vpop.permute.xlu1 %1366  ;;  %v1381_v18 = vpop.permute.xlu0 %1380 }
 0x86c   :  { %v1372_v46 = vmul.f32 %v1367_v17, %v2253_v13  ;;  %v1398_v51 = vadd.f32 %v1381_v18, %v1369_v41 }
 0x86f   :  { %v1386_v21 = vpop.permute.xlu1 %1385  ;;  %v1391_v24 = vpop.permute.xlu0 %1390 }
 0x870   :  { %v1400_v2 = vadd.f32 %v1391_v24, %v1371_v44  ;;  %v1399_v52 = vadd.f32 %v1386_v21, %v1370_v45 }
 0x873   :  { %v1396_v25 = vpop.permute.xlu1 %1395  ;;  %v1410_v28 = vpop.permute.xlu0 %1409 }
 0x874   :  { %v1401_v53 = vadd.f32 %v1396_v25, %v1372_v46 }
 0x877   :  { %v1415_v0 = vpop.permute.xlu1 %1414  ;;  %v1420_v29 = vpop.permute.xlu0 %1419 }
 0x87b   :  { %v1425_v30 = vpop.permute.xlu1 %1424  ;;  %v1447_v32 = vpop.permute.xlu0 %1446 }
 0x87f   :  { %v1452_v35 = vpop.permute.xlu1 %1451  ;;  %v1457_v5 = vpop.permute.xlu0 %1456 }
 0x883   :  { %v1462_v57 = vpop.permute.xlu1 %1461 }
 0x931   :  { %v1335_v31 = vpop.f32.mrb[12].mxu0 }
 0x932   :  { %v1336_v33 = vadd.f32 %v1335_v31, %v1293_v16  ;;  %v1750_v34 = vpop.f32.mrb[13].mxu0 }
 0x933   :  { %v1338_v38 = vpop.f32.mrb[14].mxu0 }
 0x934   :  { %vm1341_vm0 = vcmp.gt.f32.partialorder %v1336_v33, 0.0  ;;  %v1342_v39 = vmul.f32 0.01, %v1336_v33  ;;  %v1751_v40 = vpop.f32.mrb[15].mxu0 }
 0x936   :  { %v1343_v47 = vsel %vm1341_vm0, %v1336_v33, %v1342_v39 }
 0x937   :  { %v1430_v48 = vrot.slane %v1343_v47, %v2000_v26  ;;  %v1467_v50 = vrot.slane %v1343_v47, %v2002_v27 }
 0x939   :  { %v1431_v58 = vmul.f32 %v1430_v48, %v1410_v28  ;;  %v1432_v1 = vmul.f32 %v1430_v48, %v1415_v0  ;;  %v1433_v9 = vmul.f32 %v1430_v48, %v1420_v29  ;;  %v1434_v59 = vmul.f32 %v1430_v48, %v1425_v30 }
 0x93a   :  { %v1468_v10 = vmul.f32 %v1467_v50, %v1447_v32  ;;  %v1469_v60 = vmul.f32 %v1467_v50, %v1452_v35  ;;  %v1470_v43 = vmul.f32 %v1467_v50, %v1457_v5  ;;  %v1471_v19 = vmul.f32 %v1467_v50, %v1462_v57 }
 0x93b   :  { %v1435_v13 = vadd.f32 %v1431_v58, %v1398_v51  ;;  %v1436_v11 = vadd.f32 %v1432_v1, %v1399_v52  ;;  %v1437_v20 = vadd.f32 %v1433_v9, %v1400_v2  ;;  %v1438_v26 = vadd.f32 %v1434_v59, %v1401_v53 }
 0x93d   :  { %v1472_v61 = vadd.f32 %v1468_v10, %v1435_v13  ;;  %v1473_v27 = vadd.f32 %v1469_v60, %v1436_v11  ;;  %v1474_v22 = vadd.f32 %v1470_v43, %v1437_v20  ;;  %v1475_v12 = vadd.f32 %v1471_v19, %v1438_v26 }
 0x93f   :  { %vm1476_vm1 = vcmp.gt.f32.partialorder %v1472_v61, 0.0  ;;  %vm1477_vm3 = vcmp.gt.f32.partialorder %v1473_v27, 0.0  ;;  %vm1478_vm4 = vcmp.gt.f32.partialorder %v1474_v22, 0.0  ;;  %vm1479_vm11 = vcmp.gt.f32.partialorder %v1475_v12, 0.0 }
 0x940   :  { %v1480_v23 = vmul.f32 0.01, %v1472_v61  ;;  %v1481_v62 = vmul.f32 0.01, %v1473_v27  ;;  %v1482_v14 = vmul.f32 0.01, %v1474_v22 }
 0x941   :  { %v1483_v63 = vmul.f32 0.01, %v1475_v12 }
 0x942   :  { %v1484_v15 = vsel %vm1476_vm1, %v1472_v61, %v1480_v23  ;;  %v1485_v3 = vsel %vm1477_vm3, %v1473_v27, %v1481_v62  ;;  %v1486_v4 = vsel %vm1478_vm4, %v1474_v22, %v1482_v14 }
 0x943   :  { %v1487_v6 = vsel %vm1479_vm11, %v1475_v12, %v1483_v63  ;;  %1488 = vst [vmem:[%s2395_s9] sm:$0xff] %v1484_v15  ;;  %1489 = vst [vmem:[%s2395_s9 + $0x8] sm:$0xff] %v1485_v3 }
 0x944   :  { %1490 = vst [vmem:[%s2395_s9 + $0x10] sm:$0xff] %v1486_v4  ;;  %1491 = vst [vmem:[%s2395_s9 + $0x18] sm:$0xff] %v1487_v6 }

</bundles_post_ra>
